<compile_context>
chip_gen: v5e
topology: v5e:2x2
jax: 0.10.0
libtpu: 0.0.40
codegen_flags: <defaults>
</compile_context>

<pallas_src>
import functools

import jax
import jax.numpy as jnp
from jax import lax
from jax.experimental import pallas as pl
from jax.experimental.pallas import tpu as pltpu

# audiozen's constant.EPSILON == np.finfo(np.float32).eps
EPSILON = float(jnp.finfo(jnp.float32).eps)


# ----------------------------------------------------------------------------
# Chip-dependent knobs
# ----------------------------------------------------------------------------
def _device_kind():
    try:
        return jax.devices()[0].device_kind.lower()
    except Exception:
        return ""


def _tpu_config():
    """Return (vmem_limit_bytes, use_bf16_tanh) for the local chip generation."""
    kind = _device_kind()
    if "7" in kind:                       # v7x: 64 MiB physical VMEM
        vmem_limit = 56 * 1024 * 1024
    elif "v5" in kind or "v6" in kind:    # v5e/v5p/v6e: 128 MiB physical VMEM
        vmem_limit = 100 * 1024 * 1024
    else:                                 # unknown chip: conservative
        vmem_limit = 48 * 1024 * 1024
    # bf16 VPU/EUP exists on v6e / v7x only; keep f32 tanh on v5e and earlier.
    bf16_tanh = ("tpu" in kind) and not any(
        v in kind for v in ("v2", "v3", "v4", "v5"))
    return vmem_limit, bf16_tanh


# ----------------------------------------------------------------------------
# In-kernel helpers
# ----------------------------------------------------------------------------
def _gelu(x, bf16_tanh):
    """tanh-approximate GELU; tanh goes to the EUP slot (bf16 on v6e/v7x)."""
    c = 0.7978845608028654  # sqrt(2/pi)
    u = c * (x + 0.044715 * (x * x * x))
    if bf16_tanh:
        u = u.astype(jnp.bfloat16)
    t = jnp.tanh(u).astype(jnp.float32)
    return 0.5 * x * (1.0 + t)


def _tac_group_block(load_x, get_stats, store_out,
                     gnw, gnb, w1t, b1b, w2t, b2b, w3at, w3bt, b3b,
                     num_groups, bf16_tanh):
    """Process one (G, F, Tb) slab: GroupNorm -> transform -> average -> output.

    load_x(g)         -> (F, Tb) f32 slab for group g (fresh VMEM read).
    get_stats(g, xg)  -> (mean, rstd) broadcastable against (F, Tb).
    store_out(g, val) -> writes the (F, Tb) result (residual already added).
    Weights are bf16 (MXU), biases are pre-broadcast f32 planes.
    """
    hs_bf = []          # per-group (H, Tb) activations, bf16 (halved footprint)
    hm = None           # f32 running sum for the group mean
    for g in range(num_groups):
        xg = load_x(g)                                        # (F, Tb) f32
        mean, rstd = get_stats(g, xg)
        xn = ((xg - mean) * rstd) * gnw + gnb                 # GroupNorm affine
        hg = jnp.dot(w1t, xn.astype(jnp.bfloat16),
                     preferred_element_type=jnp.float32)      # (H, Tb)
        hg = _gelu(hg + b1b, bf16_tanh)
        hm = hg if hm is None else hm + hg                    # f32 accumulation
        hs_bf.append(hg.astype(jnp.bfloat16))

    hm = hm * (1.0 / num_groups)                              # group mean (H, Tb)
    avg = _gelu(jnp.dot(w2t, hm.astype(jnp.bfloat16),
                        preferred_element_type=jnp.float32) + b2b, bf16_tanh)
    # output_layer: concat([h, avg]) @ W3 == W3a^T @ h + W3b^T @ avg
    o_avg = jnp.dot(w3bt, avg.astype(jnp.bfloat16),
                    preferred_element_type=jnp.float32) + b3b  # (F, Tb)
    for g in range(num_groups):
        o1 = jnp.dot(w3at, hs_bf[g], preferred_element_type=jnp.float32)
        # residual: re-read x from VMEM here (short live range)
        store_out(g, load_x(g) + _gelu(o1 + o_avg, bf16_tanh))


# ----------------------------------------------------------------------------
# Kernel A (preferred): full-T block, GroupNorm stats fused in-kernel
# ----------------------------------------------------------------------------
def tac_kernel_fused(x_ref, gnw_ref, gnb_ref, w1t_ref, b1_ref, w2t_ref, b2_ref,
                     w3at_ref, w3bt_ref, b3_ref, out_ref, *, bf16_tanh):
    bb, num_groups, F, T = x_ref.shape
    H = w1t_ref.shape[0]

    gnw = gnw_ref[...]                       # (F, 1)
    gnb = gnb_ref[...]                       # (F, 1)
    w1t = w1t_ref[...]                       # (H, F) bf16
    w2t = w2t_ref[...]                       # (H, H) bf16
    w3at = w3at_ref[...]                     # (F, H) bf16
    w3bt = w3bt_ref[...]                     # (F, H) bf16
    # Hoisted bias broadcasts (JAX does not CSE broadcast_in_dim in the loop).
    b1b = jnp.broadcast_to(b1_ref[...], (H, T))
    b2b = jnp.broadcast_to(b2_ref[...], (H, T))
    b3b = jnp.broadcast_to(b3_ref[...], (F, T))

    inv_n = 1.0 / float(F * T)

    for b in range(bb):
        def load_x(g, b=b):
            return x_ref[b, g]

        def get_stats(g, xg):
            # Two-pass GroupNorm(1, F) stats over the full (F, T) plane of
            # this (batch, group): lane reduce then sublane reduce.
            s = jnp.sum(xg, axis=1, keepdims=True)                 # (F, 1)
            mean = jnp.sum(s, axis=0, keepdims=True) * inv_n        # (1, 1)
            d = xg - mean
            s2 = jnp.sum(d * d, axis=1, keepdims=True)
            var = jnp.sum(s2, axis=0, keepdims=True) * inv_n
            return mean, lax.rsqrt(var + EPSILON)

        def store_out(g, val, b=b):
            out_ref[b, g] = val.astype(out_ref.dtype)

        _tac_group_block(load_x, get_stats, store_out,
                         gnw, gnb, w1t, b1b, w2t, b2b, w3at, w3bt, b3b,
                         num_groups, bf16_tanh)


# ----------------------------------------------------------------------------
# Kernel B (fallback for huge T): T tiled, GroupNorm stats from a prepass
# ----------------------------------------------------------------------------
def tac_kernel_tiled(x_ref, mean_ref, rstd_ref, gnw_ref, gnb_ref, w1t_ref,
                     b1_ref, w2t_ref, b2_ref, w3at_ref, w3bt_ref, b3_ref,
                     out_ref, *, bf16_tanh):
    num_groups, F, Tb = x_ref.shape
    H = w1t_ref.shape[0]

    gnw = gnw_ref[...]
    gnb = gnb_ref[...]
    w1t = w1t_ref[...]
    w2t = w2t_ref[...]
    w3at = w3at_ref[...]
    w3bt = w3bt_ref[...]
    b1b = jnp.broadcast_to(b1_ref[...], (H, Tb))
    b2b = jnp.broadcast_to(b2_ref[...], (H, Tb))
    b3b = jnp.broadcast_to(b3_ref[...], (F, Tb))

    def load_x(g):
        return x_ref[g]

    def get_stats(g, xg):
        return mean_ref[g], rstd_ref[g]      # (1, 1) each, precomputed

    def store_out(g, val):
        out_ref[g] = val.astype(out_ref.dtype)

    _tac_group_block(load_x, get_stats, store_out,
                     gnw, gnb, w1t, b1b, w2t, b2b, w3at, w3bt, b3b,
                     num_groups, bf16_tanh)


# ----------------------------------------------------------------------------
# Sizing helpers
# ----------------------------------------------------------------------------
def _block_bytes(bb, G, F, H, tblk):
    """Rough VMEM need for one grid step (double-buffered I/O + live temps)."""
    act = bb * (4 * G * F * tblk * 4       # x + out, each double-buffered, f32
                + G * H * tblk * 2         # per-group bf16 activations
                + 4 * H * tblk * 4         # hm / avg / hoisted bias planes
                + 3 * F * tblk * 4)        # o_avg and (F, Tb) temporaries
    weights = (H * F + H * H + 2 * F * H) * 2 + (2 * H + 3 * F) * 4
    return act + weights + (1 << 20)       # ~1 MiB slack for spills/alignment


def _pick_bb(B, G, F, H, T, budget):
    """Batches per grid step: only pack >1 when per-batch blocks are tiny."""
    if B < 2 or G * F * T * 4 >= (256 << 10):
        return 1
    bb = min(8, B // 2)                    # keep >= 2 grid steps (v7x megacore)
    while bb > 1 and (B % bb != 0 or _block_bytes(bb, G, F, H, T) > budget):
        bb -= 1
    return max(bb, 1)


def _pick_t_tile(T, G, F, H, budget):
    """Lane-aligned T tile for the fallback path; prefer a divisor of T."""
    per_t = 16 * G * F + 2 * G * H + 16 * H + 12 * F
    cap = max(128, min(8192, (budget // max(per_t, 1)) // 128 * 128))
    t = cap
    while t >= 128:
        if T % t == 0:
            return t
        t -= 128
    return cap                              # ragged last tile (masked writes)


# ----------------------------------------------------------------------------
# Wrapper
# ----------------------------------------------------------------------------
def tac_forward(x, params):
    """x: (B, G, F, T) float32 -> (B, G, F, T) float32."""
    B, G, F, T = x.shape
    H = params["w1"].shape[1]

    vmem_limit, bf16_tanh = _tpu_config()
    budget = int(vmem_limit * 0.85)

    # Weight prep: transpose once so contraction axes sit on sublanes; bf16 for
    # the MXU (accumulation stays f32 via preferred_element_type).
    gnw = params["gn_w"].reshape(F, 1)
    gnb = params["gn_b"].reshape(F, 1)
    w1t = params["w1"].T.astype(jnp.bfloat16)                        # (H, F)
    w2t = params["w2"].T.astype(jnp.bfloat16)                        # (H, H)
    w3at = params["w3"][:H, :].T.astype(jnp.bfloat16)                # (F, H)
    w3bt = params["w3"][H:, :].T.astype(jnp.bfloat16)                # (F, H)
    b1 = params["b1"].reshape(H, 1)
    b2 = params["b2"].reshape(H, 1)
    b3 = params["b3"].reshape(F, 1)

    cost = pl.CostEstimate(
        flops=2 * B * T * (G * F * H + H * H + 2 * G * H * F),
        transcendentals=B * T * (G * H + H + G * F),
        bytes_accessed=2 * B * G * F * T * 4,
    )

    weight_args = (gnw, gnb, w1t, b1, w2t, b2, w3at, w3bt, b3)

    if _block_bytes(1, G, F, H, T) <= budget:
        # ---- Path A: full-T resident block, GroupNorm stats fused in-kernel.
        bb = _pick_bb(B, G, F, H, T, budget)
        grid = (B // bb,)
        weight_specs = [
            pl.BlockSpec((F, 1), lambda i: (0, 0)),                  # gn_w
            pl.BlockSpec((F, 1), lambda i: (0, 0)),                  # gn_b
            pl.BlockSpec((H, F), lambda i: (0, 0)),                  # w1^T
            pl.BlockSpec((H, 1), lambda i: (0, 0)),                  # b1
            pl.BlockSpec((H, H), lambda i: (0, 0)),                  # w2^T
            pl.BlockSpec((H, 1), lambda i: (0, 0)),                  # b2
            pl.BlockSpec((F, H), lambda i: (0, 0)),                  # w3a^T
            pl.BlockSpec((F, H), lambda i: (0, 0)),                  # w3b^T
            pl.BlockSpec((F, 1), lambda i: (0, 0)),                  # b3
        ]
        return pl.pallas_call(
            functools.partial(tac_kernel_fused, bf16_tanh=bf16_tanh),
            out_shape=jax.ShapeDtypeStruct((B, G, F, T), x.dtype),
            grid_spec=pltpu.PrefetchScalarGridSpec(
                num_scalar_prefetch=0,
                grid=grid,
                in_specs=[pl.BlockSpec((bb, G, F, T), lambda i: (i, 0, 0, 0))]
                         + weight_specs,
                out_specs=pl.BlockSpec((bb, G, F, T), lambda i: (i, 0, 0, 0)),
            ),
            compiler_params=pltpu.CompilerParams(
                dimension_semantics=("parallel",),
                vmem_limit_bytes=vmem_limit,
            ),
            cost_estimate=cost,
        )(x, *weight_args)

    # ---- Path B (fallback, huge T): tiled T + GroupNorm-stats prepass.
    # Two-pass variance (no cancellation); no jnp.pad / out-slice copies: the
    # ragged last T tile is handled by Pallas' masked edge blocks (kernel has
    # no reductions along T, so padded lanes never contaminate real outputs).
    m = jnp.mean(x, axis=(2, 3), keepdims=True)                      # (B,G,1,1)
    var = jnp.mean(jnp.square(x - m), axis=(2, 3), keepdims=True)
    rstd = lax.rsqrt(var + EPSILON)

    tT = _pick_t_tile(T, G, F, H, budget)
    nt = pl.cdiv(T, tT)
    weight_specs = [
        pl.BlockSpec((F, 1), lambda t, b: (0, 0)),
        pl.BlockSpec((F, 1), lambda t, b: (0, 0)),
        pl.BlockSpec((H, F), lambda t, b: (0, 0)),
        pl.BlockSpec((H, 1), lambda t, b: (0, 0)),
        pl.BlockSpec((H, H), lambda t, b: (0, 0)),
        pl.BlockSpec((H, 1), lambda t, b: (0, 0)),
        pl.BlockSpec((F, H), lambda t, b: (0, 0)),
        pl.BlockSpec((F, H), lambda t, b: (0, 0)),
        pl.BlockSpec((F, 1), lambda t, b: (0, 0)),
    ]
    return pl.pallas_call(
        functools.partial(tac_kernel_tiled, bf16_tanh=bf16_tanh),
        out_shape=jax.ShapeDtypeStruct((B, G, F, T), x.dtype),
        grid_spec=pltpu.PrefetchScalarGridSpec(
            num_scalar_prefetch=0,
            grid=(nt, B),   # larger axis first -> even megacore split on v7x
            in_specs=[
                pl.BlockSpec((None, G, F, tT), lambda t, b: (b, 0, 0, t)),   # x
                pl.BlockSpec((None, G, 1, 1), lambda t, b: (b, 0, 0, 0)),    # mean
                pl.BlockSpec((None, G, 1, 1), lambda t, b: (b, 0, 0, 0)),    # rstd
            ] + weight_specs,
            out_specs=pl.BlockSpec((None, G, F, tT), lambda t, b: (b, 0, 0, t)),
        ),
        compiler_params=pltpu.CompilerParams(
            dimension_semantics=("parallel", "parallel"),
            vmem_limit_bytes=vmem_limit,
        ),
        cost_estimate=cost,
    )(x, m, rstd, *weight_args)


# ----------------------------------------------------------------------------
# Parameters + pure-JAX reference (exact-erf GELU, f32)
# ----------------------------------------------------------------------------
def init_params(key, input_size, hidden_size):
    """Deterministic synthetic parameters matching the module's shapes."""
    F, H = input_size, hidden_size
    ks = jax.random.split(key, 8)

    def uni(k, shape, fan_in):
        bound = 1.0 / float(fan_in) ** 0.5
        return jax.random.uniform(k, shape, jnp.float32, -bound, bound)

    return {
        "gn_w": 1.0 + 0.1 * jax.random.normal(ks[0], (F,), jnp.float32),
        "gn_b": 0.1 * jax.random.normal(ks[1], (F,), jnp.float32),
        "w1": uni(ks[2], (F, H), F),      "b1": uni(ks[3], (H,), F),
        "w2": uni(ks[4], (H, H), H),      "b2": uni(ks[5], (H,), H),
        "w3": uni(ks[6], (2 * H, F), 2 * H), "b3": uni(ks[7], (F,), 2 * H),
    }


def _gelu_ref(x):
    # exact erf-based GELU (torch nn.GELU() default) -- reference path only
    return 0.5 * x * (1.0 + lax.erf(x * 0.7071067811865476))


def tac_reference(x, p):
    """Pure-JAX f32 replica of the PyTorch forward, for correctness checking."""
    B, G, F, T = x.shape
    H = p["w1"].shape[1]
    xr = x.reshape(B * G, F, T)
    m = xr.mean(axis=(1, 2), keepdims=True)
    v = ((xr - m) ** 2).mean(axis=(1, 2), keepdims=True)
    xn = (xr - m) / jnp.sqrt(v + EPSILON)
    xn = xn * p["gn_w"][None, :, None] + p["gn_b"][None, :, None]
    out = xn.reshape(B, G, F, T)

    gi = jnp.transpose(out, (0, 1, 3, 2)).reshape(B * G * T, F)      # (BGT, F)
    go = _gelu_ref(gi @ p["w1"] + p["b1"])                           # (BGT, H)
    go = go.reshape(B, G, T, H).transpose(0, 2, 1, 3)                # B T G H
    gm = go.mean(axis=2)                                             # B T H
    gm = _gelu_ref(gm.reshape(B * T, H) @ p["w2"] + p["b2"])         # (BT, H)
    go2 = go.reshape(B * T, G, H)
    cat = jnp.concatenate(
        [go2, jnp.broadcast_to(gm[:, None, :], (B * T, G, H))], axis=-1)
    oo = _gelu_ref(cat @ p["w3"] + p["b3"])                          # (BT, G, F)
    oo = oo.reshape(B, T, G, F).transpose(0, 2, 3, 1)                # B G F T
    return x + oo


if __name__ == "__main__":
    B, G, F, T, H = 2, 4, 16, 16, 32     # input_size = F = 16, hidden_size = 32
    key = jax.random.PRNGKey(0)
    kx, kp = jax.random.split(key)
    x = jax.random.normal(kx, (B, G, F, T), jnp.float32)
    params = init_params(kp, F, H)

    out = jax.block_until_ready(tac_forward(x, params))

    ref = tac_reference(x, params)
    assert out.shape == x.shape and out.dtype == x.dtype
    max_err = float(jnp.max(jnp.abs(out - ref)))
    # Tolerance absorbs bf16 MXU operands + (optionally bf16) tanh-approx GELU
    # vs the exact-erf f32 reference.
    if max_err > 5e-2:
        raise AssertionError(f"kernel/reference mismatch: max abs err = {max_err}")

    print("KERNEL_OK")
</pallas_src>

<mosaic_0001>
module attributes {stable_mosaic.version = 11 : i64} {
  func.func @tac_kernel_fused(%arg0: i32, %arg1: memref<1x4x16x16xf32, #tpu.memory_space<vmem>>, %arg2: memref<16x1xf32, #tpu.memory_space<vmem>>, %arg3: memref<16x1xf32, #tpu.memory_space<vmem>>, %arg4: memref<32x16xbf16, #tpu.memory_space<vmem>>, %arg5: memref<32x1xf32, #tpu.memory_space<vmem>>, %arg6: memref<32x32xbf16, #tpu.memory_space<vmem>>, %arg7: memref<32x1xf32, #tpu.memory_space<vmem>>, %arg8: memref<16x32xbf16, #tpu.memory_space<vmem>>, %arg9: memref<16x32xbf16, #tpu.memory_space<vmem>>, %arg10: memref<16x1xf32, #tpu.memory_space<vmem>>, %arg11: memref<1x4x16x16xf32, #tpu.memory_space<vmem>>) attributes {dimension_semantics = [#tpu.dimension_semantics<parallel>], iteration_bounds = array<i64: 2>, scalar_prefetch = 0 : i64, scratch_operands = 0 : i64, tpu.core_type = #tpu.core_type<tc>, window_params = [{transform_indices = @transform_0, window_bounds = array<i64: 1, 4, 16, 16>}, {pipeline_mode = #tpu.pipeline_mode<synchronous>, transform_indices = @transform_1, window_bounds = array<i64: 16, 1>}, {pipeline_mode = #tpu.pipeline_mode<synchronous>, transform_indices = @transform_2, window_bounds = array<i64: 16, 1>}, {pipeline_mode = #tpu.pipeline_mode<synchronous>, transform_indices = @transform_3, window_bounds = array<i64: 32, 16>}, {pipeline_mode = #tpu.pipeline_mode<synchronous>, transform_indices = @transform_4, window_bounds = array<i64: 32, 1>}, {pipeline_mode = #tpu.pipeline_mode<synchronous>, transform_indices = @transform_5, window_bounds = array<i64: 32, 32>}, {pipeline_mode = #tpu.pipeline_mode<synchronous>, transform_indices = @transform_6, window_bounds = array<i64: 32, 1>}, {pipeline_mode = #tpu.pipeline_mode<synchronous>, transform_indices = @transform_7, window_bounds = array<i64: 16, 32>}, {pipeline_mode = #tpu.pipeline_mode<synchronous>, transform_indices = @transform_8, window_bounds = array<i64: 16, 32>}, {pipeline_mode = #tpu.pipeline_mode<synchronous>, transform_indices = @transform_9, window_bounds = array<i64: 16, 1>}, {transform_indices = @transform_10, window_bounds = array<i64: 1, 4, 16, 16>}]} {
    %c0 = arith.constant 0 : index
    %c0_0 = arith.constant 0 : index
    %0 = vector.load %arg2[%c0, %c0_0] : memref<16x1xf32, #tpu.memory_space<vmem>>, vector<16x1xf32>
    %c0_1 = arith.constant 0 : index
    %c0_2 = arith.constant 0 : index
    %1 = vector.load %arg3[%c0_1, %c0_2] : memref<16x1xf32, #tpu.memory_space<vmem>>, vector<16x1xf32>
    %c0_3 = arith.constant 0 : index
    %c0_4 = arith.constant 0 : index
    %2 = vector.load %arg4[%c0_3, %c0_4] : memref<32x16xbf16, #tpu.memory_space<vmem>>, vector<32x16xbf16>
    %c0_5 = arith.constant 0 : index
    %c0_6 = arith.constant 0 : index
    %3 = vector.load %arg6[%c0_5, %c0_6] : memref<32x32xbf16, #tpu.memory_space<vmem>>, vector<32x32xbf16>
    %c0_7 = arith.constant 0 : index
    %c0_8 = arith.constant 0 : index
    %4 = vector.load %arg8[%c0_7, %c0_8] : memref<16x32xbf16, #tpu.memory_space<vmem>>, vector<16x32xbf16>
    %c0_9 = arith.constant 0 : index
    %c0_10 = arith.constant 0 : index
    %5 = vector.load %arg9[%c0_9, %c0_10] : memref<16x32xbf16, #tpu.memory_space<vmem>>, vector<16x32xbf16>
    %c0_11 = arith.constant 0 : index
    %c0_12 = arith.constant 0 : index
    %6 = vector.load %arg5[%c0_11, %c0_12] : memref<32x1xf32, #tpu.memory_space<vmem>>, vector<32x1xf32>
    %7 = vector.shape_cast %6 : vector<32x1xf32> to vector<32x1xf32>
    %8 = vector.broadcast %7 : vector<32x1xf32> to vector<32x16xf32>
    %c0_13 = arith.constant 0 : index
    %c0_14 = arith.constant 0 : index
    %9 = vector.load %arg7[%c0_13, %c0_14] : memref<32x1xf32, #tpu.memory_space<vmem>>, vector<32x1xf32>
    %10 = vector.shape_cast %9 : vector<32x1xf32> to vector<32x1xf32>
    %11 = vector.broadcast %10 : vector<32x1xf32> to vector<32x16xf32>
    %c0_15 = arith.constant 0 : index
    %c0_16 = arith.constant 0 : index
    %12 = vector.load %arg10[%c0_15, %c0_16] : memref<16x1xf32, #tpu.memory_space<vmem>>, vector<16x1xf32>
    %13 = vector.shape_cast %12 : vector<16x1xf32> to vector<16x1xf32>
    %14 = vector.broadcast %13 : vector<16x1xf32> to vector<16x16xf32>
    %c0_17 = arith.constant 0 : index
    %c0_18 = arith.constant 0 : index
    %c0_19 = arith.constant 0 : index
    %c0_20 = arith.constant 0 : index
    %15 = vector.load %arg1[%c0_17, %c0_18, %c0_19, %c0_20] : memref<1x4x16x16xf32, #tpu.memory_space<vmem>>, vector<1x1x16x16xf32>
    %16 = vector.shape_cast %15 : vector<1x1x16x16xf32> to vector<16x16xf32>
    %cst = arith.constant dense<0.000000e+00> : vector<16xf32>
    %17 = vector.multi_reduction <add>, %16, %cst [1] : vector<16x16xf32> to vector<16xf32>
    %18 = vector.shape_cast %17 : vector<16xf32> to vector<16x1xf32>
    %cst_21 = arith.constant dense<0.000000e+00> : vector<1xf32>
    %19 = vector.multi_reduction <add>, %18, %cst_21 [0] : vector<16x1xf32> to vector<1xf32>
    %20 = vector.shape_cast %19 : vector<1xf32> to vector<1x1xf32>
    %cst_22 = arith.constant 3.906250e-03 : f32
    %21 = vector.broadcast %cst_22 : f32 to vector<1x1xf32>
    %22 = arith.mulf %20, %21 : vector<1x1xf32>
    %23 = vector.broadcast %22 : vector<1x1xf32> to vector<16x16xf32>
    %24 = arith.subf %16, %23 : vector<16x16xf32>
    %25 = arith.mulf %24, %24 : vector<16x16xf32>
    %cst_23 = arith.constant dense<0.000000e+00> : vector<16xf32>
    %26 = vector.multi_reduction <add>, %25, %cst_23 [1] : vector<16x16xf32> to vector<16xf32>
    %27 = vector.shape_cast %26 : vector<16xf32> to vector<16x1xf32>
    %cst_24 = arith.constant dense<0.000000e+00> : vector<1xf32>
    %28 = vector.multi_reduction <add>, %27, %cst_24 [0] : vector<16x1xf32> to vector<1xf32>
    %29 = vector.shape_cast %28 : vector<1xf32> to vector<1x1xf32>
    %cst_25 = arith.constant 3.906250e-03 : f32
    %30 = vector.broadcast %cst_25 : f32 to vector<1x1xf32>
    %31 = arith.mulf %29, %30 : vector<1x1xf32>
    %cst_26 = arith.constant 1.1920929E-7 : f32
    %32 = vector.broadcast %cst_26 : f32 to vector<1x1xf32>
    %33 = arith.addf %31, %32 : vector<1x1xf32>
    %34 = math.rsqrt %33 : vector<1x1xf32>
    %35 = vector.broadcast %22 : vector<1x1xf32> to vector<16x16xf32>
    %36 = arith.subf %16, %35 : vector<16x16xf32>
    %37 = vector.broadcast %34 : vector<1x1xf32> to vector<16x16xf32>
    %38 = arith.mulf %36, %37 : vector<16x16xf32>
    %39 = vector.broadcast %0 : vector<16x1xf32> to vector<16x16xf32>
    %40 = arith.mulf %38, %39 : vector<16x16xf32>
    %41 = vector.broadcast %1 : vector<16x1xf32> to vector<16x16xf32>
    %42 = arith.addf %40, %41 : vector<16x16xf32>
    %43 = arith.truncf %42 : vector<16x16xf32> to vector<16x16xbf16>
    %cst_27 = arith.constant dense<0.000000e+00> : vector<32x16xf32>
    %44 = tpu.matmul %2, %43, %cst_27 {dimension_numbers = #tpu.dot_dimension_numbers<[1], [0], [0], [1], [0, 0, 1, 1], [], []>} : vector<32x16xbf16>, vector<16x16xbf16>, vector<32x16xf32> -> vector<32x16xf32>
    %45 = arith.addf %44, %8 : vector<32x16xf32>
    %46 = arith.mulf %45, %45 : vector<32x16xf32>
    %47 = arith.mulf %46, %45 : vector<32x16xf32>
    %cst_28 = arith.constant 4.471500e-02 : f32
    %48 = vector.broadcast %cst_28 : f32 to vector<32x16xf32>
    %49 = arith.mulf %48, %47 : vector<32x16xf32>
    %50 = arith.addf %45, %49 : vector<32x16xf32>
    %cst_29 = arith.constant 0.797884583 : f32
    %51 = vector.broadcast %cst_29 : f32 to vector<32x16xf32>
    %52 = arith.mulf %51, %50 : vector<32x16xf32>
    %53 = math.tanh %52 : vector<32x16xf32>
    %cst_30 = arith.constant 5.000000e-01 : f32
    %54 = vector.broadcast %cst_30 : f32 to vector<32x16xf32>
    %55 = arith.mulf %54, %45 : vector<32x16xf32>
    %cst_31 = arith.constant 1.000000e+00 : f32
    %56 = vector.broadcast %cst_31 : f32 to vector<32x16xf32>
    %57 = arith.addf %56, %53 : vector<32x16xf32>
    %58 = arith.mulf %55, %57 : vector<32x16xf32>
    %59 = arith.truncf %58 : vector<32x16xf32> to vector<32x16xbf16>
    %c0_32 = arith.constant 0 : index
    %c1 = arith.constant 1 : index
    %c0_33 = arith.constant 0 : index
    %c0_34 = arith.constant 0 : index
    %60 = vector.load %arg1[%c0_32, %c1, %c0_33, %c0_34] : memref<1x4x16x16xf32, #tpu.memory_space<vmem>>, vector<1x1x16x16xf32>
    %61 = vector.shape_cast %60 : vector<1x1x16x16xf32> to vector<16x16xf32>
    %cst_35 = arith.constant dense<0.000000e+00> : vector<16xf32>
    %62 = vector.multi_reduction <add>, %61, %cst_35 [1] : vector<16x16xf32> to vector<16xf32>
    %63 = vector.shape_cast %62 : vector<16xf32> to vector<16x1xf32>
    %cst_36 = arith.constant dense<0.000000e+00> : vector<1xf32>
    %64 = vector.multi_reduction <add>, %63, %cst_36 [0] : vector<16x1xf32> to vector<1xf32>
    %65 = vector.shape_cast %64 : vector<1xf32> to vector<1x1xf32>
    %cst_37 = arith.constant 3.906250e-03 : f32
    %66 = vector.broadcast %cst_37 : f32 to vector<1x1xf32>
    %67 = arith.mulf %65, %66 : vector<1x1xf32>
    %68 = vector.broadcast %67 : vector<1x1xf32> to vector<16x16xf32>
    %69 = arith.subf %61, %68 : vector<16x16xf32>
    %70 = arith.mulf %69, %69 : vector<16x16xf32>
    %cst_38 = arith.constant dense<0.000000e+00> : vector<16xf32>
    %71 = vector.multi_reduction <add>, %70, %cst_38 [1] : vector<16x16xf32> to vector<16xf32>
    %72 = vector.shape_cast %71 : vector<16xf32> to vector<16x1xf32>
    %cst_39 = arith.constant dense<0.000000e+00> : vector<1xf32>
    %73 = vector.multi_reduction <add>, %72, %cst_39 [0] : vector<16x1xf32> to vector<1xf32>
    %74 = vector.shape_cast %73 : vector<1xf32> to vector<1x1xf32>
    %cst_40 = arith.constant 3.906250e-03 : f32
    %75 = vector.broadcast %cst_40 : f32 to vector<1x1xf32>
    %76 = arith.mulf %74, %75 : vector<1x1xf32>
    %cst_41 = arith.constant 1.1920929E-7 : f32
    %77 = vector.broadcast %cst_41 : f32 to vector<1x1xf32>
    %78 = arith.addf %76, %77 : vector<1x1xf32>
    %79 = math.rsqrt %78 : vector<1x1xf32>
    %80 = vector.broadcast %67 : vector<1x1xf32> to vector<16x16xf32>
    %81 = arith.subf %61, %80 : vector<16x16xf32>
    %82 = vector.broadcast %79 : vector<1x1xf32> to vector<16x16xf32>
    %83 = arith.mulf %81, %82 : vector<16x16xf32>
    %84 = vector.broadcast %0 : vector<16x1xf32> to vector<16x16xf32>
    %85 = arith.mulf %83, %84 : vector<16x16xf32>
    %86 = vector.broadcast %1 : vector<16x1xf32> to vector<16x16xf32>
    %87 = arith.addf %85, %86 : vector<16x16xf32>
    %88 = arith.truncf %87 : vector<16x16xf32> to vector<16x16xbf16>
    %cst_42 = arith.constant dense<0.000000e+00> : vector<32x16xf32>
    %89 = tpu.matmul %2, %88, %cst_42 {dimension_numbers = #tpu.dot_dimension_numbers<[1], [0], [0], [1], [0, 0, 1, 1], [], []>} : vector<32x16xbf16>, vector<16x16xbf16>, vector<32x16xf32> -> vector<32x16xf32>
    %90 = arith.addf %89, %8 : vector<32x16xf32>
    %91 = arith.mulf %90, %90 : vector<32x16xf32>
    %92 = arith.mulf %91, %90 : vector<32x16xf32>
    %cst_43 = arith.constant 4.471500e-02 : f32
    %93 = vector.broadcast %cst_43 : f32 to vector<32x16xf32>
    %94 = arith.mulf %93, %92 : vector<32x16xf32>
    %95 = arith.addf %90, %94 : vector<32x16xf32>
    %cst_44 = arith.constant 0.797884583 : f32
    %96 = vector.broadcast %cst_44 : f32 to vector<32x16xf32>
    %97 = arith.mulf %96, %95 : vector<32x16xf32>
    %98 = math.tanh %97 : vector<32x16xf32>
    %cst_45 = arith.constant 5.000000e-01 : f32
    %99 = vector.broadcast %cst_45 : f32 to vector<32x16xf32>
    %100 = arith.mulf %99, %90 : vector<32x16xf32>
    %cst_46 = arith.constant 1.000000e+00 : f32
    %101 = vector.broadcast %cst_46 : f32 to vector<32x16xf32>
    %102 = arith.addf %101, %98 : vector<32x16xf32>
    %103 = arith.mulf %100, %102 : vector<32x16xf32>
    %104 = arith.addf %58, %103 : vector<32x16xf32>
    %105 = arith.truncf %103 : vector<32x16xf32> to vector<32x16xbf16>
    %c0_47 = arith.constant 0 : index
    %c2 = arith.constant 2 : index
    %c0_48 = arith.constant 0 : index
    %c0_49 = arith.constant 0 : index
    %106 = vector.load %arg1[%c0_47, %c2, %c0_48, %c0_49] : memref<1x4x16x16xf32, #tpu.memory_space<vmem>>, vector<1x1x16x16xf32>
    %107 = vector.shape_cast %106 : vector<1x1x16x16xf32> to vector<16x16xf32>
    %cst_50 = arith.constant dense<0.000000e+00> : vector<16xf32>
    %108 = vector.multi_reduction <add>, %107, %cst_50 [1] : vector<16x16xf32> to vector<16xf32>
    %109 = vector.shape_cast %108 : vector<16xf32> to vector<16x1xf32>
    %cst_51 = arith.constant dense<0.000000e+00> : vector<1xf32>
    %110 = vector.multi_reduction <add>, %109, %cst_51 [0] : vector<16x1xf32> to vector<1xf32>
    %111 = vector.shape_cast %110 : vector<1xf32> to vector<1x1xf32>
    %cst_52 = arith.constant 3.906250e-03 : f32
    %112 = vector.broadcast %cst_52 : f32 to vector<1x1xf32>
    %113 = arith.mulf %111, %112 : vector<1x1xf32>
    %114 = vector.broadcast %113 : vector<1x1xf32> to vector<16x16xf32>
    %115 = arith.subf %107, %114 : vector<16x16xf32>
    %116 = arith.mulf %115, %115 : vector<16x16xf32>
    %cst_53 = arith.constant dense<0.000000e+00> : vector<16xf32>
    %117 = vector.multi_reduction <add>, %116, %cst_53 [1] : vector<16x16xf32> to vector<16xf32>
    %118 = vector.shape_cast %117 : vector<16xf32> to vector<16x1xf32>
    %cst_54 = arith.constant dense<0.000000e+00> : vector<1xf32>
    %119 = vector.multi_reduction <add>, %118, %cst_54 [0] : vector<16x1xf32> to vector<1xf32>
    %120 = vector.shape_cast %119 : vector<1xf32> to vector<1x1xf32>
    %cst_55 = arith.constant 3.906250e-03 : f32
    %121 = vector.broadcast %cst_55 : f32 to vector<1x1xf32>
    %122 = arith.mulf %120, %121 : vector<1x1xf32>
    %cst_56 = arith.constant 1.1920929E-7 : f32
    %123 = vector.broadcast %cst_56 : f32 to vector<1x1xf32>
    %124 = arith.addf %122, %123 : vector<1x1xf32>
    %125 = math.rsqrt %124 : vector<1x1xf32>
    %126 = vector.broadcast %113 : vector<1x1xf32> to vector<16x16xf32>
    %127 = arith.subf %107, %126 : vector<16x16xf32>
    %128 = vector.broadcast %125 : vector<1x1xf32> to vector<16x16xf32>
    %129 = arith.mulf %127, %128 : vector<16x16xf32>
    %130 = vector.broadcast %0 : vector<16x1xf32> to vector<16x16xf32>
    %131 = arith.mulf %129, %130 : vector<16x16xf32>
    %132 = vector.broadcast %1 : vector<16x1xf32> to vector<16x16xf32>
    %133 = arith.addf %131, %132 : vector<16x16xf32>
    %134 = arith.truncf %133 : vector<16x16xf32> to vector<16x16xbf16>
    %cst_57 = arith.constant dense<0.000000e+00> : vector<32x16xf32>
    %135 = tpu.matmul %2, %134, %cst_57 {dimension_numbers = #tpu.dot_dimension_numbers<[1], [0], [0], [1], [0, 0, 1, 1], [], []>} : vector<32x16xbf16>, vector<16x16xbf16>, vector<32x16xf32> -> vector<32x16xf32>
    %136 = arith.addf %135, %8 : vector<32x16xf32>
    %137 = arith.mulf %136, %136 : vector<32x16xf32>
    %138 = arith.mulf %137, %136 : vector<32x16xf32>
    %cst_58 = arith.constant 4.471500e-02 : f32
    %139 = vector.broadcast %cst_58 : f32 to vector<32x16xf32>
    %140 = arith.mulf %139, %138 : vector<32x16xf32>
    %141 = arith.addf %136, %140 : vector<32x16xf32>
    %cst_59 = arith.constant 0.797884583 : f32
    %142 = vector.broadcast %cst_59 : f32 to vector<32x16xf32>
    %143 = arith.mulf %142, %141 : vector<32x16xf32>
    %144 = math.tanh %143 : vector<32x16xf32>
    %cst_60 = arith.constant 5.000000e-01 : f32
    %145 = vector.broadcast %cst_60 : f32 to vector<32x16xf32>
    %146 = arith.mulf %145, %136 : vector<32x16xf32>
    %cst_61 = arith.constant 1.000000e+00 : f32
    %147 = vector.broadcast %cst_61 : f32 to vector<32x16xf32>
    %148 = arith.addf %147, %144 : vector<32x16xf32>
    %149 = arith.mulf %146, %148 : vector<32x16xf32>
    %150 = arith.addf %104, %149 : vector<32x16xf32>
    %151 = arith.truncf %149 : vector<32x16xf32> to vector<32x16xbf16>
    %c0_62 = arith.constant 0 : index
    %c3 = arith.constant 3 : index
    %c0_63 = arith.constant 0 : index
    %c0_64 = arith.constant 0 : index
    %152 = vector.load %arg1[%c0_62, %c3, %c0_63, %c0_64] : memref<1x4x16x16xf32, #tpu.memory_space<vmem>>, vector<1x1x16x16xf32>
    %153 = vector.shape_cast %152 : vector<1x1x16x16xf32> to vector<16x16xf32>
    %cst_65 = arith.constant dense<0.000000e+00> : vector<16xf32>
    %154 = vector.multi_reduction <add>, %153, %cst_65 [1] : vector<16x16xf32> to vector<16xf32>
    %155 = vector.shape_cast %154 : vector<16xf32> to vector<16x1xf32>
    %cst_66 = arith.constant dense<0.000000e+00> : vector<1xf32>
    %156 = vector.multi_reduction <add>, %155, %cst_66 [0] : vector<16x1xf32> to vector<1xf32>
    %157 = vector.shape_cast %156 : vector<1xf32> to vector<1x1xf32>
    %cst_67 = arith.constant 3.906250e-03 : f32
    %158 = vector.broadcast %cst_67 : f32 to vector<1x1xf32>
    %159 = arith.mulf %157, %158 : vector<1x1xf32>
    %160 = vector.broadcast %159 : vector<1x1xf32> to vector<16x16xf32>
    %161 = arith.subf %153, %160 : vector<16x16xf32>
    %162 = arith.mulf %161, %161 : vector<16x16xf32>
    %cst_68 = arith.constant dense<0.000000e+00> : vector<16xf32>
    %163 = vector.multi_reduction <add>, %162, %cst_68 [1] : vector<16x16xf32> to vector<16xf32>
    %164 = vector.shape_cast %163 : vector<16xf32> to vector<16x1xf32>
    %cst_69 = arith.constant dense<0.000000e+00> : vector<1xf32>
    %165 = vector.multi_reduction <add>, %164, %cst_69 [0] : vector<16x1xf32> to vector<1xf32>
    %166 = vector.shape_cast %165 : vector<1xf32> to vector<1x1xf32>
    %cst_70 = arith.constant 3.906250e-03 : f32
    %167 = vector.broadcast %cst_70 : f32 to vector<1x1xf32>
    %168 = arith.mulf %166, %167 : vector<1x1xf32>
    %cst_71 = arith.constant 1.1920929E-7 : f32
    %169 = vector.broadcast %cst_71 : f32 to vector<1x1xf32>
    %170 = arith.addf %168, %169 : vector<1x1xf32>
    %171 = math.rsqrt %170 : vector<1x1xf32>
    %172 = vector.broadcast %159 : vector<1x1xf32> to vector<16x16xf32>
    %173 = arith.subf %153, %172 : vector<16x16xf32>
    %174 = vector.broadcast %171 : vector<1x1xf32> to vector<16x16xf32>
    %175 = arith.mulf %173, %174 : vector<16x16xf32>
    %176 = vector.broadcast %0 : vector<16x1xf32> to vector<16x16xf32>
    %177 = arith.mulf %175, %176 : vector<16x16xf32>
    %178 = vector.broadcast %1 : vector<16x1xf32> to vector<16x16xf32>
    %179 = arith.addf %177, %178 : vector<16x16xf32>
    %180 = arith.truncf %179 : vector<16x16xf32> to vector<16x16xbf16>
    %cst_72 = arith.constant dense<0.000000e+00> : vector<32x16xf32>
    %181 = tpu.matmul %2, %180, %cst_72 {dimension_numbers = #tpu.dot_dimension_numbers<[1], [0], [0], [1], [0, 0, 1, 1], [], []>} : vector<32x16xbf16>, vector<16x16xbf16>, vector<32x16xf32> -> vector<32x16xf32>
    %182 = arith.addf %181, %8 : vector<32x16xf32>
    %183 = arith.mulf %182, %182 : vector<32x16xf32>
    %184 = arith.mulf %183, %182 : vector<32x16xf32>
    %cst_73 = arith.constant 4.471500e-02 : f32
    %185 = vector.broadcast %cst_73 : f32 to vector<32x16xf32>
    %186 = arith.mulf %185, %184 : vector<32x16xf32>
    %187 = arith.addf %182, %186 : vector<32x16xf32>
    %cst_74 = arith.constant 0.797884583 : f32
    %188 = vector.broadcast %cst_74 : f32 to vector<32x16xf32>
    %189 = arith.mulf %188, %187 : vector<32x16xf32>
    %190 = math.tanh %189 : vector<32x16xf32>
    %cst_75 = arith.constant 5.000000e-01 : f32
    %191 = vector.broadcast %cst_75 : f32 to vector<32x16xf32>
    %192 = arith.mulf %191, %182 : vector<32x16xf32>
    %cst_76 = arith.constant 1.000000e+00 : f32
    %193 = vector.broadcast %cst_76 : f32 to vector<32x16xf32>
    %194 = arith.addf %193, %190 : vector<32x16xf32>
    %195 = arith.mulf %192, %194 : vector<32x16xf32>
    %196 = arith.addf %150, %195 : vector<32x16xf32>
    %197 = arith.truncf %195 : vector<32x16xf32> to vector<32x16xbf16>
    %cst_77 = arith.constant 2.500000e-01 : f32
    %198 = vector.broadcast %cst_77 : f32 to vector<32x16xf32>
    %199 = arith.mulf %196, %198 : vector<32x16xf32>
    %200 = arith.truncf %199 : vector<32x16xf32> to vector<32x16xbf16>
    %cst_78 = arith.constant dense<0.000000e+00> : vector<32x16xf32>
    %201 = tpu.matmul %3, %200, %cst_78 {dimension_numbers = #tpu.dot_dimension_numbers<[1], [0], [0], [1], [0, 0, 1, 1], [], []>} : vector<32x32xbf16>, vector<32x16xbf16>, vector<32x16xf32> -> vector<32x16xf32>
    %202 = arith.addf %201, %11 : vector<32x16xf32>
    %203 = arith.mulf %202, %202 : vector<32x16xf32>
    %204 = arith.mulf %203, %202 : vector<32x16xf32>
    %cst_79 = arith.constant 4.471500e-02 : f32
    %205 = vector.broadcast %cst_79 : f32 to vector<32x16xf32>
    %206 = arith.mulf %205, %204 : vector<32x16xf32>
    %207 = arith.addf %202, %206 : vector<32x16xf32>
    %cst_80 = arith.constant 0.797884583 : f32
    %208 = vector.broadcast %cst_80 : f32 to vector<32x16xf32>
    %209 = arith.mulf %208, %207 : vector<32x16xf32>
    %210 = math.tanh %209 : vector<32x16xf32>
    %cst_81 = arith.constant 5.000000e-01 : f32
    %211 = vector.broadcast %cst_81 : f32 to vector<32x16xf32>
    %212 = arith.mulf %211, %202 : vector<32x16xf32>
    %cst_82 = arith.constant 1.000000e+00 : f32
    %213 = vector.broadcast %cst_82 : f32 to vector<32x16xf32>
    %214 = arith.addf %213, %210 : vector<32x16xf32>
    %215 = arith.mulf %212, %214 : vector<32x16xf32>
    %216 = arith.truncf %215 : vector<32x16xf32> to vector<32x16xbf16>
    %cst_83 = arith.constant dense<0.000000e+00> : vector<16x16xf32>
    %217 = tpu.matmul %5, %216, %cst_83 {dimension_numbers = #tpu.dot_dimension_numbers<[1], [0], [0], [1], [0, 0, 1, 1], [], []>} : vector<16x32xbf16>, vector<32x16xbf16>, vector<16x16xf32> -> vector<16x16xf32>
    %218 = arith.addf %217, %14 : vector<16x16xf32>
    %cst_84 = arith.constant dense<0.000000e+00> : vector<16x16xf32>
    %219 = tpu.matmul %4, %59, %cst_84 {dimension_numbers = #tpu.dot_dimension_numbers<[1], [0], [0], [1], [0, 0, 1, 1], [], []>} : vector<16x32xbf16>, vector<32x16xbf16>, vector<16x16xf32> -> vector<16x16xf32>
    %c0_85 = arith.constant 0 : index
    %c0_86 = arith.constant 0 : index
    %c0_87 = arith.constant 0 : index
    %c0_88 = arith.constant 0 : index
    %220 = vector.load %arg1[%c0_85, %c0_86, %c0_87, %c0_88] : memref<1x4x16x16xf32, #tpu.memory_space<vmem>>, vector<1x1x16x16xf32>
    %221 = vector.shape_cast %220 : vector<1x1x16x16xf32> to vector<16x16xf32>
    %222 = arith.addf %219, %218 : vector<16x16xf32>
    %223 = arith.mulf %222, %222 : vector<16x16xf32>
    %224 = arith.mulf %223, %222 : vector<16x16xf32>
    %cst_89 = arith.constant 4.471500e-02 : f32
    %225 = vector.broadcast %cst_89 : f32 to vector<16x16xf32>
    %226 = arith.mulf %225, %224 : vector<16x16xf32>
    %227 = arith.addf %222, %226 : vector<16x16xf32>
    %cst_90 = arith.constant 0.797884583 : f32
    %228 = vector.broadcast %cst_90 : f32 to vector<16x16xf32>
    %229 = arith.mulf %228, %227 : vector<16x16xf32>
    %230 = math.tanh %229 : vector<16x16xf32>
    %cst_91 = arith.constant 5.000000e-01 : f32
    %231 = vector.broadcast %cst_91 : f32 to vector<16x16xf32>
    %232 = arith.mulf %231, %222 : vector<16x16xf32>
    %cst_92 = arith.constant 1.000000e+00 : f32
    %233 = vector.broadcast %cst_92 : f32 to vector<16x16xf32>
    %234 = arith.addf %233, %230 : vector<16x16xf32>
    %235 = arith.mulf %232, %234 : vector<16x16xf32>
    %236 = arith.addf %221, %235 : vector<16x16xf32>
    %c0_93 = arith.constant 0 : index
    %c0_94 = arith.constant 0 : index
    %c0_95 = arith.constant 0 : index
    %c0_96 = arith.constant 0 : index
    %237 = vector.load %arg11[%c0_93, %c0_94, %c0_95, %c0_96] : memref<1x4x16x16xf32, #tpu.memory_space<vmem>>, vector<1x1x16x16xf32>
    %238 = vector.shape_cast %237 : vector<1x1x16x16xf32> to vector<16x16xf32>
    %239 = vector.shape_cast %236 : vector<16x16xf32> to vector<1x1x16x16xf32>
    tpu.vector_store %arg11[%c0_93, %c0_94, %c0_95, %c0_96], %239 {strides = array<i32>} : memref<1x4x16x16xf32, #tpu.memory_space<vmem>>, vector<1x1x16x16xf32>,
    %cst_97 = arith.constant dense<0.000000e+00> : vector<16x16xf32>
    %240 = tpu.matmul %4, %105, %cst_97 {dimension_numbers = #tpu.dot_dimension_numbers<[1], [0], [0], [1], [0, 0, 1, 1], [], []>} : vector<16x32xbf16>, vector<32x16xbf16>, vector<16x16xf32> -> vector<16x16xf32>
    %c0_98 = arith.constant 0 : index
    %c1_99 = arith.constant 1 : index
    %c0_100 = arith.constant 0 : index
    %c0_101 = arith.constant 0 : index
    %241 = vector.load %arg1[%c0_98, %c1_99, %c0_100, %c0_101] : memref<1x4x16x16xf32, #tpu.memory_space<vmem>>, vector<1x1x16x16xf32>
    %242 = vector.shape_cast %241 : vector<1x1x16x16xf32> to vector<16x16xf32>
    %243 = arith.addf %240, %218 : vector<16x16xf32>
    %244 = arith.mulf %243, %243 : vector<16x16xf32>
    %245 = arith.mulf %244, %243 : vector<16x16xf32>
    %cst_102 = arith.constant 4.471500e-02 : f32
    %246 = vector.broadcast %cst_102 : f32 to vector<16x16xf32>
    %247 = arith.mulf %246, %245 : vector<16x16xf32>
    %248 = arith.addf %243, %247 : vector<16x16xf32>
    %cst_103 = arith.constant 0.797884583 : f32
    %249 = vector.broadcast %cst_103 : f32 to vector<16x16xf32>
    %250 = arith.mulf %249, %248 : vector<16x16xf32>
    %251 = math.tanh %250 : vector<16x16xf32>
    %cst_104 = arith.constant 5.000000e-01 : f32
    %252 = vector.broadcast %cst_104 : f32 to vector<16x16xf32>
    %253 = arith.mulf %252, %243 : vector<16x16xf32>
    %cst_105 = arith.constant 1.000000e+00 : f32
    %254 = vector.broadcast %cst_105 : f32 to vector<16x16xf32>
    %255 = arith.addf %254, %251 : vector<16x16xf32>
    %256 = arith.mulf %253, %255 : vector<16x16xf32>
    %257 = arith.addf %242, %256 : vector<16x16xf32>
    %c0_106 = arith.constant 0 : index
    %c1_107 = arith.constant 1 : index
    %c0_108 = arith.constant 0 : index
    %c0_109 = arith.constant 0 : index
    %258 = vector.load %arg11[%c0_106, %c1_107, %c0_108, %c0_109] : memref<1x4x16x16xf32, #tpu.memory_space<vmem>>, vector<1x1x16x16xf32>
    %259 = vector.shape_cast %258 : vector<1x1x16x16xf32> to vector<16x16xf32>
    %260 = vector.shape_cast %257 : vector<16x16xf32> to vector<1x1x16x16xf32>
    tpu.vector_store %arg11[%c0_106, %c1_107, %c0_108, %c0_109], %260 {strides = array<i32>} : memref<1x4x16x16xf32, #tpu.memory_space<vmem>>, vector<1x1x16x16xf32>,
    %cst_110 = arith.constant dense<0.000000e+00> : vector<16x16xf32>
    %261 = tpu.matmul %4, %151, %cst_110 {dimension_numbers = #tpu.dot_dimension_numbers<[1], [0], [0], [1], [0, 0, 1, 1], [], []>} : vector<16x32xbf16>, vector<32x16xbf16>, vector<16x16xf32> -> vector<16x16xf32>
    %c0_111 = arith.constant 0 : index
    %c2_112 = arith.constant 2 : index
    %c0_113 = arith.constant 0 : index
    %c0_114 = arith.constant 0 : index
    %262 = vector.load %arg1[%c0_111, %c2_112, %c0_113, %c0_114] : memref<1x4x16x16xf32, #tpu.memory_space<vmem>>, vector<1x1x16x16xf32>
    %263 = vector.shape_cast %262 : vector<1x1x16x16xf32> to vector<16x16xf32>
    %264 = arith.addf %261, %218 : vector<16x16xf32>
    %265 = arith.mulf %264, %264 : vector<16x16xf32>
    %266 = arith.mulf %265, %264 : vector<16x16xf32>
    %cst_115 = arith.constant 4.471500e-02 : f32
    %267 = vector.broadcast %cst_115 : f32 to vector<16x16xf32>
    %268 = arith.mulf %267, %266 : vector<16x16xf32>
    %269 = arith.addf %264, %268 : vector<16x16xf32>
    %cst_116 = arith.constant 0.797884583 : f32
    %270 = vector.broadcast %cst_116 : f32 to vector<16x16xf32>
    %271 = arith.mulf %270, %269 : vector<16x16xf32>
    %272 = math.tanh %271 : vector<16x16xf32>
    %cst_117 = arith.constant 5.000000e-01 : f32
    %273 = vector.broadcast %cst_117 : f32 to vector<16x16xf32>
    %274 = arith.mulf %273, %264 : vector<16x16xf32>
    %cst_118 = arith.constant 1.000000e+00 : f32
    %275 = vector.broadcast %cst_118 : f32 to vector<16x16xf32>
    %276 = arith.addf %275, %272 : vector<16x16xf32>
    %277 = arith.mulf %274, %276 : vector<16x16xf32>
    %278 = arith.addf %263, %277 : vector<16x16xf32>
    %c0_119 = arith.constant 0 : index
    %c2_120 = arith.constant 2 : index
    %c0_121 = arith.constant 0 : index
    %c0_122 = arith.constant 0 : index
    %279 = vector.load %arg11[%c0_119, %c2_120, %c0_121, %c0_122] : memref<1x4x16x16xf32, #tpu.memory_space<vmem>>, vector<1x1x16x16xf32>
    %280 = vector.shape_cast %279 : vector<1x1x16x16xf32> to vector<16x16xf32>
    %281 = vector.shape_cast %278 : vector<16x16xf32> to vector<1x1x16x16xf32>
    tpu.vector_store %arg11[%c0_119, %c2_120, %c0_121, %c0_122], %281 {strides = array<i32>} : memref<1x4x16x16xf32, #tpu.memory_space<vmem>>, vector<1x1x16x16xf32>,
    %cst_123 = arith.constant dense<0.000000e+00> : vector<16x16xf32>
    %282 = tpu.matmul %4, %197, %cst_123 {dimension_numbers = #tpu.dot_dimension_numbers<[1], [0], [0], [1], [0, 0, 1, 1], [], []>} : vector<16x32xbf16>, vector<32x16xbf16>, vector<16x16xf32> -> vector<16x16xf32>
    %c0_124 = arith.constant 0 : index
    %c3_125 = arith.constant 3 : index
    %c0_126 = arith.constant 0 : index
    %c0_127 = arith.constant 0 : index
    %283 = vector.load %arg1[%c0_124, %c3_125, %c0_126, %c0_127] : memref<1x4x16x16xf32, #tpu.memory_space<vmem>>, vector<1x1x16x16xf32>
    %284 = vector.shape_cast %283 : vector<1x1x16x16xf32> to vector<16x16xf32>
    %285 = arith.addf %282, %218 : vector<16x16xf32>
    %286 = arith.mulf %285, %285 : vector<16x16xf32>
    %287 = arith.mulf %286, %285 : vector<16x16xf32>
    %cst_128 = arith.constant 4.471500e-02 : f32
    %288 = vector.broadcast %cst_128 : f32 to vector<16x16xf32>
    %289 = arith.mulf %288, %287 : vector<16x16xf32>
    %290 = arith.addf %285, %289 : vector<16x16xf32>
    %cst_129 = arith.constant 0.797884583 : f32
    %291 = vector.broadcast %cst_129 : f32 to vector<16x16xf32>
    %292 = arith.mulf %291, %290 : vector<16x16xf32>
    %293 = math.tanh %292 : vector<16x16xf32>
    %cst_130 = arith.constant 5.000000e-01 : f32
    %294 = vector.broadcast %cst_130 : f32 to vector<16x16xf32>
    %295 = arith.mulf %294, %285 : vector<16x16xf32>
    %cst_131 = arith.constant 1.000000e+00 : f32
    %296 = vector.broadcast %cst_131 : f32 to vector<16x16xf32>
    %297 = arith.addf %296, %293 : vector<16x16xf32>
    %298 = arith.mulf %295, %297 : vector<16x16xf32>
    %299 = arith.addf %284, %298 : vector<16x16xf32>
    %c0_132 = arith.constant 0 : index
    %c3_133 = arith.constant 3 : index
    %c0_134 = arith.constant 0 : index
    %c0_135 = arith.constant 0 : index
    %300 = vector.load %arg11[%c0_132, %c3_133, %c0_134, %c0_135] : memref<1x4x16x16xf32, #tpu.memory_space<vmem>>, vector<1x1x16x16xf32>
    %301 = vector.shape_cast %300 : vector<1x1x16x16xf32> to vector<16x16xf32>
    %302 = vector.shape_cast %299 : vector<16x16xf32> to vector<1x1x16x16xf32>
    tpu.vector_store %arg11[%c0_132, %c3_133, %c0_134, %c0_135], %302 {strides = array<i32>} : memref<1x4x16x16xf32, #tpu.memory_space<vmem>>, vector<1x1x16x16xf32>,
    return
  }
  func.func @transform_0(%arg0: i32) -> (i32, i32, i32, i32) {
    %c0_i32 = arith.constant 0 : i32
    %c0_i32_0 = arith.constant 0 : i32
    %c0_i32_1 = arith.constant 0 : i32
    %c0_i32_2 = arith.constant 0 : i32
    return %arg0, %c0_i32, %c0_i32_0, %c0_i32_1 : i32, i32, i32, i32
  }
  func.func @transform_1(%arg0: i32) -> (i32, i32) {
    %c0_i32 = arith.constant 0 : i32
    %c0_i32_0 = arith.constant 0 : i32
    %c0_i32_1 = arith.constant 0 : i32
    return %c0_i32, %c0_i32_0 : i32, i32
  }
  func.func @transform_2(%arg0: i32) -> (i32, i32) {
    %c0_i32 = arith.constant 0 : i32
    %c0_i32_0 = arith.constant 0 : i32
    %c0_i32_1 = arith.constant 0 : i32
    return %c0_i32, %c0_i32_0 : i32, i32
  }
  func.func @transform_3(%arg0: i32) -> (i32, i32) {
    %c0_i32 = arith.constant 0 : i32
    %c0_i32_0 = arith.constant 0 : i32
    %c0_i32_1 = arith.constant 0 : i32
    return %c0_i32, %c0_i32_0 : i32, i32
  }
  func.func @transform_4(%arg0: i32) -> (i32, i32) {
    %c0_i32 = arith.constant 0 : i32
    %c0_i32_0 = arith.constant 0 : i32
    %c0_i32_1 = arith.constant 0 : i32
    return %c0_i32, %c0_i32_0 : i32, i32
  }
  func.func @transform_5(%arg0: i32) -> (i32, i32) {
    %c0_i32 = arith.constant 0 : i32
    %c0_i32_0 = arith.constant 0 : i32
    %c0_i32_1 = arith.constant 0 : i32
    return %c0_i32, %c0_i32_0 : i32, i32
  }
  func.func @transform_6(%arg0: i32) -> (i32, i32) {
    %c0_i32 = arith.constant 0 : i32
    %c0_i32_0 = arith.constant 0 : i32
    %c0_i32_1 = arith.constant 0 : i32
    return %c0_i32, %c0_i32_0 : i32, i32
  }
  func.func @transform_7(%arg0: i32) -> (i32, i32) {
    %c0_i32 = arith.constant 0 : i32
    %c0_i32_0 = arith.constant 0 : i32
    %c0_i32_1 = arith.constant 0 : i32
    return %c0_i32, %c0_i32_0 : i32, i32
  }
  func.func @transform_8(%arg0: i32) -> (i32, i32) {
    %c0_i32 = arith.constant 0 : i32
    %c0_i32_0 = arith.constant 0 : i32
    %c0_i32_1 = arith.constant 0 : i32
    return %c0_i32, %c0_i32_0 : i32, i32
  }
  func.func @transform_9(%arg0: i32) -> (i32, i32) {
    %c0_i32 = arith.constant 0 : i32
    %c0_i32_0 = arith.constant 0 : i32
    %c0_i32_1 = arith.constant 0 : i32
    return %c0_i32, %c0_i32_0 : i32, i32
  }
  func.func @transform_10(%arg0: i32) -> (i32, i32, i32, i32) {
    %c0_i32 = arith.constant 0 : i32
    %c0_i32_0 = arith.constant 0 : i32
    %c0_i32_1 = arith.constant 0 : i32
    %c0_i32_2 = arith.constant 0 : i32
    return %arg0, %c0_i32, %c0_i32_0, %c0_i32_1 : i32, i32, i32, i32
  }
}

</mosaic_0001>

<bundles_post_ra>
// kernel: tpu_custom_call.1
= control target key start
LH: loop header
LB: loop body
LE: loop exit
PB: predicated region body
PF: predicated region fallthrough
CT: control target
= control target key end

     0   :  { %15 = vsyncpa [#allocation3], 0  ;;  %s2225_s0 = inlined_call_operand.vmem [shape: f32[2,4,16,16], index: 0, kind: input, shape index: {}]   ;;  %s2226_s1 = inlined_call_operand.vmem [shape: f32[16,1], index: 1, kind: input, shape index: {}]   ;;  %s2227_s2 = inlined_call_operand.vmem [shape: f32[16,1], index: 2, kind: input, shape index: {}]   ;;  %s2228_s3 = inlined_call_operand.vmem [shape: bf16[32,16], index: 3, kind: input, shape index: {}]   ;;  %s2229_s4 = inlined_call_operand.vmem [shape: f32[32,1], index: 4, kind: input, shape index: {}]   ;;  %s2230_s5 = inlined_call_operand.vmem [shape: bf16[32,32], index: 5, kind: input, shape index: {}]   ;;  %s2231_s6 = inlined_call_operand.vmem [shape: f32[32,1], index: 6, kind: input, shape index: {}]   ;;  %s2232_s7 = inlined_call_operand.hbm [shape: bf16[16,32], index: 7, kind: input, shape index: {}]   ;;  %s2233_s8 = inlined_call_operand.hbm [shape: bf16[16,32], index: 8, kind: input, shape index: {}]   ;;  %s2234_s9 = inlined_call_operand.vmem [shape: f32[16,1], index: 9, kind: input, shape index: {}]   ;;  %s2235_s10 = inlined_call_operand.hbm [shape: f32[2,4,16,16], index: 10, kind: output, shape index: {}]  }
   0x1   :  { %16 = vsyncpa [#allocation6], 0 }
   0x2   :  { %17 = vsyncpa [#allocation4], 0 }
   0x3   :  { %19 = vsyncpa [#allocation4 + $0x1], 0  ;;  %s1729_s13 = smov 0   ;;  %s1731_s14 = smov 0  }
   0x4   :  { %s1733_s15 = smov 0   ;;  %s1735_s16 = smov 0  }
   0x5 LB: > { %s1750_s17 = sadd.s32 4294967295, %s1665_s16   ;;  %s1320_s18 = sadd.s32 4294967294, %s1665_s16   ;;  %s1665_s16 = sphi %s1735_s16, %s2244_s16   ;;  %s1661_s15 = sphi %s1733_s15, %s2243_s15   ;;  %s1657_s14 = sphi %s1731_s14, %s2242_s14   ;;  %s1653_s13 = sphi %s1729_s13, %s2241_s13  }
   0x6   : > { %s1754_s19 = sadd.s32 1, %s1665_s16   ;;  %s247_s20 = sadd.s32 1, %s1661_s15 }
   0x7   : > { %s244_s21 = ssub.s32 %s1665_s16, %s1754_s19  ;;  %p257_p0 = scmp.ne.s32.totalorder %s1661_s15, %s1657_s14 }
   0x8   : > { %p245_p1 = scmp.eq.s32.totalorder %s244_s21, 0  ;;  %p258_p2 = scmp.eq.s32.totalorder %s1750_s17, 1 }
   0x9   : > { %p263_p3 = scmp.ne.s32.totalorder %s1657_s14, %s1653_s13  ;;  %p264_p4 = scmp.eq.s32.totalorder %s1320_s18, 1 }
   0xa   : > { %s1765_s22 = scalar_select %p245_p1, %s1661_s15, %s247_s20  }
   0xb   : > { %p1767_p5 = por %p258_p2, %p257_p0  ;;  %p1771_p6 = por %p264_p4, %p263_p3 }
   0xc   : > { %2236 = sst [smem:[#allocation11_spill]] %s1765_s22  ;;  %p1321_p7 = scmp.ge.s32.totalorder %s1665_s16, 1 }
   0xd   : > { %p271_p8 = scmp.lt.s32.totalorder %s1665_s16, 3  ;;  %p1422_p9 = scmp.eq.s32.totalorder %s1750_s17, 0 }
   0xe   : > { %s300_s28 = sshll.u32 %s2232_s7, 4  ;;  %s1667_s29 = smov [#allocation2]   ;;  %s301_s28 = int_to_ptr.hbm [resolvable:$true] %s300_s28 }
   0xf   : > { %p1778_p10 = pnand %p1321_p7, %p271_p8  ;;  %s302_s30 = sshll.u32 %s1667_s29, 4  ;;  %s303_s30 = int_to_ptr.vmem [resolvable:$true] %s302_s30 }
  0x10   : > { %s314_s18 = sshll.u32 %s2233_s8, 4  ;;  %s1668_s20 = smov 64   ;;  %s315_s18 = int_to_ptr.hbm [resolvable:$true] %s314_s18 }
  0x11   : > { %p1411_p11 = pneg %p1778_p10  ;;  %s1669_s21 = smov 4  }
  0x12   : > { %s1670_s22 = smov [#allocation5]   ;;  %343 = sbr.rel (%p1778_p10) target bundleno = 967 (0x3c7), region = 60 }
  0x13   : > { %p1412_p12 = pnand %p1422_p9, %p1411_p11  ;;  %s316_s26 = sshll.u32 %s1670_s22, 4  ;;  %s317_s26 = int_to_ptr.vmem [resolvable:$true] %s316_s26 }
  0x15   : > { %1414 = dma.hbm_to_vmem [thread:$0]  (!%p1412_p12), %s301_s28, 128, %s303_s30, [#allocation3], %s1668_s20, %s1668_s20, %s1669_s21  }
  0x16   : > { %1417 = dma.hbm_to_vmem [thread:$0]  (!%p1412_p12), %s315_s18, 128, %s317_s26, [#allocation6], %s1668_s20, %s1668_s20, %s1669_s21  }
  0x17   : > { %1640 = dma.done.wait (%p1422_p9), [#allocation3], 128  }
  0x18   : > { %1642 = vsyncadd (%p1422_p9), [#allocation3], 4294967168 }
  0x19   : > { %1644 = dma.done.wait (%p1422_p9), [#allocation6], 128  }
  0x1a   : > { %1646 = vsyncadd (%p1422_p9), [#allocation6], 4294967168  ;;  %p387_p13 = scmp.lt.s32.totalorder %s1750_s17, 1  ;;  %vm471_vm0 = vcmask 130048   ;;  %v1671_v33 = vmov 0   ;;  %vm973_vm13 = vcmask 261120  }
  0x1b   : > { %1467 = vset.pattern.permute.xlu2 %v1671_v33  ;;  %1466 = vset.pattern.permute.xlu1 %v1671_v33  ;;  %s384_s18 = sand.u32 1, %s1657_s14   ;;  %s1400_s26 = sshll.u32 %s1750_s17, 6 }
  0x1c   : > { %s388_s22 = scalar_select %p387_p13, %s1750_s17, 1  ;;  %1468 = vset.pattern.permute.xlu0 %v1671_v33  ;;  %v433_v33 = vld [vmem:[%s2231_s6] sm:$0xff] }
  0x1d   : > { %s1328_s20 = sshll.u32 %s384_s18, 6  ;;  %s1232_s28 = scalar_lea.hbm %s2235_s10, %s1400_s26 }
  0x1e   : > { %s1393_s27 = sshll.u32 %s388_s22, 6  ;;  %s2164_s21 = scalar_lea.vmem [#allocation7], %s1328_s20 }
  0x1f   : > { %s1807_s29 = scalar_lea.vmem %s2225_s0, %s1393_s27  ;;  %s1233_s25 = sshll.u32 %s2164_s21, 4  ;;  %s1234_s25 = int_to_ptr.vmem [resolvable:$true] %s1233_s25 }
  0x20   : > { %v1810_v0 = vld [vmem:[%s1807_s29 + $0x30] sm:$0xff]  ;;  %v1813_v1 = vld [vmem:[%s1807_s29 + $0x20] sm:$0xff]  ;;  %v1825_v6 = vld [vmem:[%s1807_s29 + $0x38] sm:$0xff]  ;;  %s1235_s30 = sshll.u32 %s1232_s28, 4  ;;  %s1221_s17 = scalar_lea.sflag [#allocation4], %s384_s18  ;;  %s1236_s30 = int_to_ptr.hbm [resolvable:$true] %s1235_s30 }
  0x21   : > { %v846_v2 = vsel %vm471_vm0, %v1810_v0, 0.0  ;;  %v732_v3 = vsel %vm471_vm0, %v1813_v1, 0.0  ;;  %v1820_v4 = vld [vmem:[%s1807_s29] sm:$0xff]  ;;  %v1346_v7 = vld [vmem:[%s1807_s29 + $0x28] sm:$0xff]  ;;  %v849_v9 = vsel %vm471_vm0, %v1825_v6, 0.0  ;;  %v1834_v12 = vld [vmem:[%s1807_s29 + $0x18] sm:$0xff] }
  0x22   : > { %847 = vadd.xlane.f32.xlu1 %v846_v2  ;;  %733 = vadd.xlane.f32.xlu0 %v732_v3  ;;  %v472_v5 = vsel %vm471_vm0, %v1820_v4, 0.0  ;;  %v470_v8 = vld [vmem:[%s1807_s29 + $0x8] sm:$0xff]  ;;  %v735_v10 = vsel %vm471_vm0, %v1346_v7, 0.0  ;;  %v1837_v13 = vld [vmem:[%s1807_s29 + $0x10] sm:$0xff]  ;;  %v621_v14 = vsel %vm471_vm0, %v1834_v12, 0.0  ;;  %s1609_s11 = sshra.s32 %s1236_s30, 4  ;;  %s1610_s11 = int_to_ptr.hbm [resolvable:$true] %s1609_s11 }
  0x23   : > { %473 = vadd.xlane.f32.xlu2 %v472_v5  ;;  %v475_v11 = vsel %vm471_vm0, %v470_v8, 0.0  ;;  %v618_v15 = vsel %vm471_vm0, %v1837_v13, 0.0  ;;  %s1611_s12 = scalar_lea.hbm %s1610_s11, 64  ;;  %s1615_s22 = scalar_lea.hbm %s2235_s10, 128 }
  0x24   : > { %p1612_p0 = scmp.ne.s32.totalorder %s1610_s11, %s1611_s12  ;;  %p1616_p3 = scmp.lt.s32.totalorder %s1610_s11, %s2235_s10 }
  0x25   : > { %p1617_p4 = scmp.lt.s32.totalorder %s1615_s22, %s1611_s12 }
  0x26   : > { %p1613_p1 = pnand %p1612_p0, %p1767_p5 }
  0x27   : > { %p1618_p7 = por %p1617_p4, %p1616_p3 }
  0x28   : > { %p1614_p2 = pneg %p1613_p1 }
  0x2a   : > { %850 = vadd.xlane.f32.xlu1 %v849_v9  ;;  %736 = vadd.xlane.f32.xlu0 %v735_v10  ;;  %p1619_p8 = pnand %p1618_p7, %p1614_p2 }
  0x2b   : > { %476 = vadd.xlane.f32.xlu2 %v475_v11 }
  0x32   : > { %622 = vadd.xlane.f32.xlu1 %v621_v14  ;;  %619 = vadd.xlane.f32.xlu0 %v618_v15 }
  0x95   : > { %v848_v16 = vpop.xlane.xlu1 %847  ;;  %v734_v17 = vpop.xlane.xlu0 %733 }
  0x96   : > { %v474_v18 = vpop.xlane.xlu2 %473 }
  0x9d   : > { %v851_v19 = vpop.xlane.xlu1 %850  ;;  %v737_v20 = vpop.xlane.xlu0 %736 }
  0x9e   : > { %v852_v21 = vadd.f32 %v851_v19, %v848_v16  ;;  %v738_v22 = vadd.f32 %v737_v20, %v734_v17  ;;  %v477_v23 = vpop.xlane.xlu2 %476  ;;  %v394_v16 = vld [vmem:[%s2226_s1 + $0x8] sm:$0xff]  ;;  %v395_v17 = vld [vmem:[%s2227_s2] sm:$0xff] }
  0x9f   : > { %v478_v24 = vadd.f32 %v477_v23, %v474_v18  ;;  %v411_v18 = vld [vmem:[%s2229_s4 + $0x10] sm:$0xff]  ;;  %v409_v19 = vld [vmem:[%s2229_s4] sm:$0xff] }
  0xa0   : > { %v853_v25 = vrot.slane %v852_v21, 4  ;;  %v739_v26 = vrot.slane %v738_v22, 4 }
  0xa1   : > { %v479_v27 = vrot.slane %v478_v24, 4 }
  0xa2   : > { %v854_v28 = vadd.f32 %v853_v25, %v852_v21  ;;  %v740_v29 = vadd.f32 %v739_v26, %v738_v22  ;;  %v435_v21 = vld [vmem:[%s2231_s6 + $0x10] sm:$0xff]  ;;  %v436_v22 = vld [vmem:[%s2231_s6 + $0x18] sm:$0xff]  ;;  %v457_v25 = vld [vmem:[%s2234_s9] sm:$0xff] }
  0xa3   : > { %v480_v30 = vadd.f32 %v479_v27, %v478_v24  ;;  %v396_v26 = vld [vmem:[%s2227_s2 + $0x8] sm:$0xff]  ;;  %v412_v27 = vld [vmem:[%s2229_s4 + $0x18] sm:$0xff] }
  0xa4   : > { %v855_v31 = vrot.slane %v854_v28, 2  ;;  %v741_v32 = vrot.slane %v740_v29, 2 }
  0xa5   : > { %v481_v34 = vrot.slane %v480_v30, 2  ;;  %v623_v35 = vpop.xlane.xlu1 %622  ;;  %v620_v36 = vpop.xlane.xlu0 %619 }
  0xa6   : > { %v856_v37 = vadd.f32 %v855_v31, %v854_v28  ;;  %v742_v38 = vadd.f32 %v741_v32, %v740_v29  ;;  %v624_v39 = vadd.f32 %v623_v35, %v620_v36  ;;  %v410_v28 = vld [vmem:[%s2229_s4 + $0x8] sm:$0xff] }
  0xa7   : > { %v482_v40 = vadd.f32 %v481_v34, %v480_v30 }
  0xa8   : > { %v857_v41 = vrot.slane %v856_v37, 1  ;;  %v743_v42 = vrot.slane %v742_v38, 1  ;;  %v625_v43 = vrot.slane %v624_v39, 4 }
  0xa9   : > { %v483_v44 = vrot.slane %v482_v40, 1 }
  0xaa   : > { %v858_v45 = vadd.f32 %v857_v41, %v856_v37  ;;  %v744_v46 = vadd.f32 %v743_v42, %v742_v38  ;;  %v626_v47 = vadd.f32 %v625_v43, %v624_v39  ;;  %v458_v43 = vld [vmem:[%s2234_s9 + $0x8] sm:$0xff] }
  0xab   : > { %v484_v48 = vadd.f32 %v483_v44, %v482_v40 }
  0xac   : > { %v627_v49 = vrot.slane %v626_v47, 2  ;;  %v859_v50 = vmul.f32 0.00390625, %v858_v45  ;;  %v745_v51 = vmul.f32 0.00390625, %v744_v46 }
  0xad   : > { %v485_v52 = vmul.f32 0.00390625, %v484_v48 }
  0xae   : > { %v628_v53 = vadd.f32 %v627_v49, %v626_v47  ;;  %v1844_v54 = vsub.f32 %v1810_v0, %v859_v50  ;;  %v1846_v55 = vsub.f32 %v1346_v7, %v745_v51  ;;  %v1849_v56 = vsub.f32 %v1813_v1, %v745_v51 }
  0xaf   : > { %v1851_v57 = vsub.f32 %v470_v8, %v485_v52  ;;  %v1854_v58 = vsub.f32 %v1820_v4, %v485_v52  ;;  %v1866_v3 = vsub.f32 %v1825_v6, %v859_v50 }
  0xb0   : > { %v629_v59 = vrot.slane %v628_v53, 1  ;;  %v862_v60 = vmul.f32 %v1844_v54, %v1844_v54  ;;  %v749_v61 = vmul.f32 %v1846_v55, %v1846_v55  ;;  %v748_v62 = vmul.f32 %v1849_v56, %v1849_v56 }
  0xb1   : > { %v489_v4 = vmul.f32 %v1851_v57, %v1851_v57  ;;  %v488_v5 = vmul.f32 %v1854_v58, %v1854_v58  ;;  %v863_v8 = vmul.f32 %v1866_v3, %v1866_v3 }
  0xb2   : > { %v630_v63 = vadd.f32 %v629_v59, %v628_v53  ;;  %v864_v0 = vsel %vm471_vm0, %v862_v60, 0.0  ;;  %v753_v1 = vsel %vm471_vm0, %v749_v61, 0.0  ;;  %v750_v2 = vsel %vm471_vm0, %v748_v62, 0.0 }
  0xb3   : > { %865 = vadd.xlane.f32.xlu1 %v864_v0  ;;  %754 = vadd.xlane.f32.xlu0 %v753_v1  ;;  %v493_v9 = vsel %vm471_vm0, %v489_v4, 0.0  ;;  %v490_v10 = vsel %vm471_vm0, %v488_v5, 0.0  ;;  %v867_v6 = vsel %vm471_vm0, %v863_v8, 0.0 }
  0xb4   : > { %751 = vadd.xlane.f32.xlu2 %v750_v2  ;;  %v631_v7 = vmul.f32 0.00390625, %v630_v63 }
  0xb6   : > { %v1877_v11 = vsub.f32 %v1834_v12, %v631_v7  ;;  %v393_v12 = vld [vmem:[%s2226_s1] sm:$0xff]  ;;  %v1899_v20 = vsub.f32 %v1837_v13, %v631_v7  ;;  %v434_v13 = vld [vmem:[%s2231_s6 + $0x8] sm:$0xff] }
  0xb8   : > { %v635_v14 = vmul.f32 %v1877_v11, %v1877_v11  ;;  %v634_v23 = vmul.f32 %v1899_v20, %v1899_v20 }
  0xba   : > { %v639_v15 = vsel %vm471_vm0, %v635_v14, 0.0  ;;  %v636_v24 = vsel %vm471_vm0, %v634_v23, 0.0 }
  0xbb   : > { %494 = vadd.xlane.f32.xlu1 %v493_v9  ;;  %491 = vadd.xlane.f32.xlu0 %v490_v10 }
  0xbc   : > { %868 = vadd.xlane.f32.xlu2 %v867_v6 }
  0xc3   : > { %640 = vadd.xlane.f32.xlu0 %v639_v15 }
  0xd4   : > { %524 = vperm.xlu2 %1467, %v394_v16   ;;  %519 = vperm.xlu1 %1466, %v393_v12  }
  0xd7   : > { %531 = vperm.xlu0 %1468, %v395_v17  }
  0xdc   : > { %425 = vperm.xlu1 %1466, %v411_v18  }
  0xdf   : > { %454 = vperm.xlu0 %1468, %v436_v22  }
  0xe4   : > { %415 = vperm.xlu1 %1466, %v409_v19  }
  0xe7   : > { %461 = vperm.xlu0 %1468, %v457_v25  }
  0xec   : > { %449 = vperm.xlu1 %1466, %v435_v21  }
  0xf4   : > { %444 = vperm.xlu1 %1466, %v434_v13  }
  0xfd   : > { %637 = vadd.xlane.f32.xlu2 %v636_v24 }
 0x115   : > { %536 = vperm.xlu2 %1467, %v396_v26  }
 0x11d   : > { %430 = vperm.xlu2 %1467, %v412_v27  }
 0x125   : > { %420 = vperm.xlu2 %1467, %v410_v28  }
 0x126   : > { %v866_v29 = vpop.xlane.xlu1 %865  ;;  %v755_v30 = vpop.xlane.xlu0 %754 }
 0x127   : > { %v752_v31 = vpop.xlane.xlu2 %751 }
 0x128   : > { %v756_v32 = vadd.f32 %v755_v30, %v752_v31 }
 0x12a   : > { %v757_v34 = vrot.slane %v756_v32, 4 }
 0x12c   : > { %v758_v41 = vadd.f32 %v757_v34, %v756_v32 }
 0x12d   : > { %439 = vperm.xlu2 %1467, %v433_v33  }
 0x12e   : > { %v495_v35 = vpop.xlane.xlu1 %494  ;;  %v492_v36 = vpop.xlane.xlu0 %491  ;;  %v759_v46 = vrot.slane %v758_v41, 2 }
 0x12f   : > { %v496_v37 = vadd.f32 %v495_v35, %v492_v36  ;;  %v869_v38 = vpop.xlane.xlu2 %868 }
 0x130   : > { %v870_v39 = vadd.f32 %v869_v38, %v866_v29  ;;  %v760_v49 = vadd.f32 %v759_v46, %v758_v41 }
 0x131   : > { %v497_v40 = vrot.slane %v496_v37, 4 }
 0x132   : > { %v871_v42 = vrot.slane %v870_v39, 4  ;;  %v761_v52 = vrot.slane %v760_v49, 1 }
 0x133   : > { %v498_v44 = vadd.f32 %v497_v40, %v496_v37 }
 0x134   : > { %v872_v45 = vadd.f32 %v871_v42, %v870_v39  ;;  %v762_v60 = vadd.f32 %v761_v52, %v760_v49 }
 0x135   : > { %466 = vperm.xlu2 %1467, %v458_v43   ;;  %v499_v47 = vrot.slane %v498_v44, 2 }
 0x136   : > { %v873_v48 = vrot.slane %v872_v45, 2  ;;  %v763_v63 = vmul.f32 0.00390625, %v762_v60  ;;  %v641_v27 = vpop.xlane.xlu0 %640 }
 0x137   : > { %v500_v50 = vadd.f32 %v499_v47, %v498_v44  ;;  %v1931_v24 = vpop.permute.xlu2 %524 }
 0x138   : > { %v874_v51 = vadd.f32 %v873_v48, %v872_v45  ;;  %v764_v2 = vadd.f32 1.1920929e-07, %v763_v63 }
 0x139   : > { %v501_v53 = vrot.slane %v500_v50, 1 }
 0x13a   : > { %v875_v59 = vrot.slane %v874_v51, 1  ;;  %1469 = vrsqrt.f32 %v764_v2  ;;  %vm771_vm6 = vweird.f32 %v764_v2 }
 0x13b   : > { %v502_v61 = vadd.f32 %v501_v53, %v500_v50 }
 0x13c   : > { %v876_v62 = vadd.f32 %v875_v59, %v874_v51 }
 0x13d   : > { %v503_v0 = vmul.f32 0.00390625, %v502_v61  ;;  %v1394_v61 = vld [vmem:[%s2228_s3] sm:$0xff] }
 0x13e   : > { %v877_v1 = vmul.f32 0.00390625, %v876_v62 }
 0x13f   : > { %v504_v4 = vadd.f32 1.1920929e-07, %v503_v0 }
 0x140   : > { %v878_v5 = vadd.f32 1.1920929e-07, %v877_v1  ;;  %v1470_v7 = vpop.eup %1469 }
 0x141   : > { %1471 = vrsqrt.f32 %v504_v4  ;;  %v766_v10 = vmul.f32 %v1470_v7, %v764_v2  ;;  %vm511_vm1 = vweird.f32 %v504_v4  ;;  %vm772_vm3 = vweird.f32 %v1470_v7 }
 0x142   : > { %1473 = vrsqrt.f32 %v878_v5  ;;  %vm773_vm7 = vmor %vm771_vm6, %vm772_vm3  ;;  %vm885_vm8 = vweird.f32 %v878_v5 }
 0x143   : > { %v767_v15 = vmul.f32 %v1470_v7, %v766_v10 }
 0x145   : > { %v768_v18 = vmul.f32 0.5, %v767_v15 }
 0x146   : > { %v520_v35 = vpop.permute.xlu1 %519 }
 0x147   : > { %v1472_v8 = vpop.eup %1471  ;;  %v769_v22 = vsub.f32 1.5, %v768_v18 }
 0x148   : > { %v1474_v9 = vpop.eup %1473  ;;  %v506_v6 = vmul.f32 %v1472_v8, %v504_v4  ;;  %vm512_vm2 = vweird.f32 %v1472_v8 }
 0x149   : > { %v880_v14 = vmul.f32 %v1474_v9, %v878_v5  ;;  %v770_v25 = vmul.f32 %v1470_v7, %v769_v22  ;;  %vm886_vm4 = vweird.f32 %v1474_v9  ;;  %vm513_vm5 = vmor %vm511_vm1, %vm512_vm2  ;;  %v532_v44 = vpop.permute.xlu0 %531  ;;  %v1395_v5 = vld [vmem:[%s2228_s3 + $0x8] sm:$0xff] }
 0x14a   : > { %v507_v16 = vmul.f32 %v1472_v8, %v506_v6  ;;  %vm887_vm9 = vmor %vm885_vm8, %vm886_vm4 }
 0x14b   : > { %v881_v12 = vmul.f32 %v1474_v9, %v880_v14  ;;  %v774_v29 = vsel %vm773_vm7, %v1470_v7, %v770_v25 }
 0x14c   : > { %v508_v17 = vmul.f32 0.5, %v507_v16  ;;  %v775_v33 = vmul.f32 %v774_v29, %v1849_v56  ;;  %v776_v39 = vmul.f32 %v774_v29, %v1846_v55 }
 0x14d   : > { %v882_v19 = vmul.f32 0.5, %v881_v12 }
 0x14e   : > { %v509_v21 = vsub.f32 1.5, %v508_v17  ;;  %v777_v42 = vmul.f32 %v775_v33, %v520_v35  ;;  %v778_v56 = vmul.f32 %v776_v39, %v1931_v24 }
 0x14f   : > { %v883_v23 = vsub.f32 1.5, %v882_v19  ;;  %v1959_v19 = vpop.permute.xlu1 %425 }
 0x150   : > { %v510_v13 = vmul.f32 %v1472_v8, %v509_v21  ;;  %v779_v49 = vadd.f32 %v777_v42, %v532_v44 }
 0x151   : > { %v884_v26 = vmul.f32 %v1474_v9, %v883_v23 }
 0x152   : > { %v514_v28 = vsel %vm513_vm5, %v1472_v8, %v510_v13 }
 0x153   : > { %v888_v30 = vsel %vm887_vm9, %v1474_v9, %v884_v26  ;;  %v515_v32 = vmul.f32 %v514_v28, %v1854_v58  ;;  %v516_v38 = vmul.f32 %v514_v28, %v1851_v57 }
 0x154   : > { %v889_v34 = vmul.f32 %v888_v30, %v1844_v54  ;;  %v890_v40 = vmul.f32 %v888_v30, %v1866_v3 }
 0x155   : > { %v527_v41 = vmul.f32 %v520_v35, %v515_v32  ;;  %v528_v58 = vmul.f32 %v1931_v24, %v516_v38 }
 0x156   : > { %v891_v43 = vmul.f32 %v889_v34, %v520_v35  ;;  %v892_v54 = vmul.f32 %v890_v40, %v1931_v24 }
 0x157   : > { %v539_v48 = vadd.f32 %v532_v44, %v527_v41  ;;  %v1963_v23 = vpop.permute.xlu1 %415 }
 0x158   : > { %v893_v57 = vadd.f32 %v891_v43, %v532_v44 }
 0x170   : > { %v638_v31 = vpop.xlane.xlu2 %637 }
 0x171   : > { %v642_v36 = vadd.f32 %v641_v27, %v638_v31 }
 0x173   : > { %v643_v37 = vrot.slane %v642_v36, 4 }
 0x175   : > { %v644_v45 = vadd.f32 %v643_v37, %v642_v36 }
 0x177   : > { %v645_v46 = vrot.slane %v644_v45, 2 }
 0x178   : > { %v537_v47 = vpop.permute.xlu2 %536 }
 0x179   : > { %v646_v50 = vadd.f32 %v645_v46, %v644_v45  ;;  %v540_v55 = vadd.f32 %v537_v47, %v528_v58  ;;  %v780_v51 = vadd.f32 %v778_v56, %v537_v47  ;;  %v894_v3 = vadd.f32 %v892_v54, %v537_v47 }
 0x17b   : > { %v647_v52 = vrot.slane %v646_v50, 1  ;;  %v541_v53 = vpack.c.bf16 %v540_v55, %v539_v48  ;;  %v781_v59 = vpack.c.bf16 %v780_v51, %v779_v49  ;;  %v895_v60 = vpack.c.bf16 %v894_v3, %v893_v57 }
 0x17d   : > { %v648_v62 = vadd.f32 %v647_v52, %v646_v50  ;;  %565 = vmatpush.bf16.msra.mxu0 %v541_v53  ;;  %789 = vmatpush.bf16.msra.mxu2 %v781_v59 }
 0x17e   : > { %903 = vmatpush.bf16.msra.mxu3 %v895_v60 }
 0x17f   : > { %v649_v63 = vmul.f32 0.00390625, %v648_v62 }
 0x180   : > { %1339 = vmatmul.msk.bf16.vlgmr.msra.gmra.mxu0 %vm471_vm0, %v1394_v61  ;;  %1347 = vmatmul.msk.bf16.vlgmr.msra.gmra.mxu2 %vm471_vm0, %v1394_v61  ;;  %v1961_v21 = vpop.permute.xlu2 %430 }
 0x181   : > { %v650_v0 = vadd.f32 1.1920929e-07, %v649_v63  ;;  %1351 = vmatmul.msk.bf16.vlgmr.msra.gmra.mxu3 %vm471_vm0, %v1394_v61 }
 0x183   : > { %1475 = vrsqrt.f32 %v650_v0  ;;  %vm657_vm11 = vweird.f32 %v650_v0 }
 0x188   : > { %v1973_v27 = vpop.permute.xlu2 %420 }
 0x189   : > { %v1476_v1 = vpop.eup %1475 }
 0x18a   : > { %v652_v2 = vmul.f32 %v1476_v1, %v650_v0  ;;  %vm658_vm10 = vweird.f32 %v1476_v1 }
 0x18b   : > { %vm659_vm12 = vmor %vm657_vm11, %vm658_vm10 }
 0x18c   : > { %v653_v4 = vmul.f32 %v1476_v1, %v652_v2 }
 0x18e   : > { %v654_v7 = vmul.f32 0.5, %v653_v4 }
 0x190   : > { %1340 = vmatmul.msk.bf16.gmra.mxu0 %vm471_vm0, %v1395_v5  ;;  %1348 = vmatmul.msk.bf16.gmra.mxu2 %vm471_vm0, %v1395_v5  ;;  %v655_v8 = vsub.f32 1.5, %v654_v7 }
 0x191   : > { %1352 = vmatmul.msk.bf16.gmra.mxu3 %vm471_vm0, %v1395_v5 }
 0x192   : > { %v656_v9 = vmul.f32 %v1476_v1, %v655_v8 }
 0x194   : > { %v660_v10 = vsel %vm659_vm12, %v1476_v1, %v656_v9 }
 0x195   : > { %v661_v6 = vmul.f32 %v660_v10, %v1899_v20  ;;  %v662_v14 = vmul.f32 %v660_v10, %v1877_v11 }
 0x197   : > { %v663_v15 = vmul.f32 %v661_v6, %v520_v35  ;;  %v664_v16 = vmul.f32 %v662_v14, %v1931_v24 }
 0x199   : > { %v665_v12 = vadd.f32 %v663_v15, %v532_v44  ;;  %v666_v17 = vadd.f32 %v664_v16, %v537_v47 }
 0x19b   : > { %v667_v18 = vpack.c.bf16 %v666_v17, %v665_v12 }
 0x19d   : > { %675 = vmatpush.bf16.msra.mxu1 %v667_v18 }
 0x1a0   : > { %1343 = vmatmul.msk.bf16.vlgmr.msra.gmra.mxu1 %vm471_vm0, %v1394_v61 }
 0x1b0   : > { %1344 = vmatmul.msk.bf16.gmra.mxu1 %vm471_vm0, %v1395_v5 }
 0x1fd   : > { %v567_v22 = vpop.f32.mrf.mxu0 }
 0x1fe   : > { %v1969_v13 = vadd.f32 %v567_v22, %v1963_v23 }
 0x200   : > { %v577_v30 = vmul.f32 %v1969_v13, %v1969_v13 }
 0x202   : > { %v581_v36 = vmul.f32 %v577_v30, %v1969_v13 }
 0x203   : > { %v791_v20 = vpop.f32.mrf.mxu2 }
 0x204   : > { %v1966_v11 = vadd.f32 %v791_v20, %v1963_v23  ;;  %v905_v24 = vpop.f32.mrf.mxu3  ;;  %v585_v46 = vmul.f32 0.044715, %v581_v36 }
 0x205   : > { %v569_v25 = vpop.f32.mrf.mxu0  ;;  %v1988_v38 = vadd.f32 %v905_v24, %v1963_v23 }
 0x206   : > { %v801_v26 = vmul.f32 %v1966_v11, %v1966_v11  ;;  %v1977_v29 = vadd.f32 %v569_v25, %v1973_v27  ;;  %v589_v59 = vadd.f32 %v585_v46, %v1969_v13 }
 0x207   : > { %v915_v58 = vmul.f32 %v1988_v38, %v1988_v38 }
 0x208   : > { %v805_v28 = vmul.f32 %v801_v26, %v1966_v11  ;;  %v578_v33 = vmul.f32 %v1977_v29, %v1977_v29  ;;  %v593_v9 = vmul.f32 0.7978846, %v589_v59 }
 0x209   : > { %v919_v60 = vmul.f32 %v915_v58, %v1988_v38 }
 0x20a   : > { %v809_v31 = vmul.f32 0.044715, %v805_v28  ;;  %v582_v43 = vmul.f32 %v578_v33, %v1977_v29 }
 0x20b   : > { %v793_v32 = vpop.f32.mrf.mxu2  ;;  %v923_v10 = vmul.f32 0.044715, %v919_v60 }
 0x20c   : > { %v1984_v34 = vadd.f32 %v793_v32, %v1973_v27  ;;  %v907_v35 = vpop.f32.mrf.mxu3  ;;  %v813_v41 = vadd.f32 %v809_v31, %v1966_v11  ;;  %v586_v57 = vmul.f32 0.044715, %v582_v43 }
 0x20d   : > { %v572_v37 = vpop.f32.mrf.mxu0  ;;  %v1997_v42 = vadd.f32 %v907_v35, %v1973_v27  ;;  %v927_v32 = vadd.f32 %v923_v10, %v1988_v38 }
 0x20e   : > { %v802_v39 = vmul.f32 %v1984_v34, %v1984_v34  ;;  %v1993_v40 = vadd.f32 %v572_v37, %v1959_v19  ;;  %v817_v47 = vmul.f32 0.7978846, %v813_v41  ;;  %v590_v7 = vadd.f32 %v586_v57, %v1977_v29 }
 0x20f   : > { %v916_v48 = vmul.f32 %v1997_v42, %v1997_v42 }
 0x210   : > { %v806_v44 = vmul.f32 %v802_v39, %v1984_v34  ;;  %v579_v45 = vmul.f32 %v1993_v40, %v1993_v40  ;;  %1477 = vtanh.f32 %v817_v47  ;;  %v594_v25 = vmul.f32 0.7978846, %v590_v7 }
 0x211   : > { %v920_v0 = vmul.f32 %v916_v48, %v1997_v42  ;;  %v931_v47 = vmul.f32 0.7978846, %v927_v32  ;;  %v826_v48 = vmul.f32 0.5, %v1984_v34  ;;  %v603_v10 = vmul.f32 0.5, %v1993_v40 }
 0x212   : > { %v810_v56 = vmul.f32 0.044715, %v806_v44  ;;  %v583_v54 = vmul.f32 %v579_v45, %v1993_v40 }
 0x213   : > { %v796_v49 = vpop.f32.mrf.mxu2  ;;  %v924_v15 = vmul.f32 0.044715, %v920_v0 }
 0x214   : > { %v814_v50 = vadd.f32 %v810_v56, %v1984_v34  ;;  %v587_v55 = vmul.f32 0.044715, %v583_v54  ;;  %v2010_v51 = vadd.f32 %v796_v49, %v1959_v19  ;;  %v910_v3 = vpop.f32.mrf.mxu3  ;;  %v825_v54 = vmul.f32 0.5, %v1966_v11 }
 0x215   : > { %v2013_v52 = vadd.f32 %v910_v3, %v1959_v19  ;;  %v574_v53 = vpop.f32.mrf.mxu0  ;;  %v928_v35 = vadd.f32 %v924_v15, %v1997_v42 }
 0x216   : > { %v818_v61 = vmul.f32 0.7978846, %v814_v50  ;;  %v803_v62 = vmul.f32 %v2010_v51, %v2010_v51  ;;  %v2020_v63 = vadd.f32 %v574_v53, %v1961_v21  ;;  %v591_v2 = vadd.f32 %v587_v55, %v1993_v40  ;;  %v1478_v26 = vpop.eup %1477 }
 0x217   : > { %v917_v1 = vmul.f32 %v2013_v52, %v2013_v52  ;;  %v829_v44 = vadd.f32 1.0, %v1478_v26  ;;  %v932_v57 = vmul.f32 0.7978846, %v928_v35  ;;  %v940_v40 = vmul.f32 0.5, %v1997_v42 }
 0x218   : > { %v807_v4 = vmul.f32 %v803_v62, %v2010_v51  ;;  %v580_v5 = vmul.f32 %v2020_v63, %v2020_v63  ;;  %1479 = vtanh.f32 %v818_v61  ;;  %v595_v17 = vmul.f32 0.7978846, %v591_v2 }
 0x219   : > { %v921_v8 = vmul.f32 %v917_v1, %v2013_v52  ;;  %1481 = vtanh.f32 %v593_v9  ;;  %v2055_v59 = vmul.f32 %v829_v44, %v825_v54  ;;  %v604_v15 = vmul.f32 0.5, %v2020_v63 }
 0x21a   : > { %v811_v6 = vmul.f32 0.044715, %v807_v4  ;;  %v584_v14 = vmul.f32 %v580_v5, %v2020_v63  ;;  %1483 = vtanh.f32 %v595_v17  ;;  %v827_v32 = vmul.f32 0.5, %v2010_v51 }
 0x21b   : > { %v925_v16 = vmul.f32 0.044715, %v921_v8  ;;  %v798_v12 = vpop.f32.mrf.mxu2  ;;  %1485 = vtanh.f32 %v594_v25  ;;  %v941_v44 = vmul.f32 0.5, %v2013_v52 }
 0x21c   : > { %v815_v18 = vadd.f32 %v811_v6, %v2010_v51  ;;  %v588_v22 = vmul.f32 0.044715, %v584_v14  ;;  %v2034_v20 = vadd.f32 %v798_v12, %v1961_v21  ;;  %v912_v24 = vpop.f32.mrf.mxu3 }
 0x21d   : > { %v929_v28 = vadd.f32 %v925_v16, %v2013_v52  ;;  %v2038_v30 = vadd.f32 %v912_v24, %v1961_v21  ;;  %v677_v31 = vpop.f32.mrf.mxu1 }
 0x21e   : > { %v804_v33 = vmul.f32 %v2034_v20, %v2034_v20  ;;  %v592_v37 = vadd.f32 %v588_v22, %v2020_v63  ;;  %v1480_v39 = vpop.eup %1479  ;;  %v819_v41 = vmul.f32 0.7978846, %v815_v18  ;;  %v2050_v58 = vadd.f32 %v677_v31, %v1963_v23 }
 0x21f   : > { %v918_v36 = vmul.f32 %v2038_v30, %v2038_v30  ;;  %v933_v45 = vmul.f32 0.7978846, %v929_v28  ;;  %v830_v55 = vadd.f32 1.0, %v1480_v39  ;;  %v1482_v3 = vpop.eup %1481  ;;  %v601_v18 = vmul.f32 0.5, %v1969_v13 }
 0x220   : > { %v808_v43 = vmul.f32 %v804_v33, %v2034_v20  ;;  %v596_v56 = vmul.f32 0.7978846, %v592_v37  ;;  %v1484_v60 = vpop.eup %1483  ;;  %v687_v11 = vmul.f32 %v2050_v58, %v2050_v58  ;;  %v605_v6 = vadd.f32 1.0, %v1482_v3 }
 0x221   : > { %v922_v46 = vmul.f32 %v918_v36, %v2038_v30  ;;  %v2060_v34 = vmul.f32 %v830_v55, %v826_v48  ;;  %v1486_v62 = vpop.eup %1485  ;;  %v607_v7 = vadd.f32 1.0, %v1484_v60  ;;  %v602_v22 = vmul.f32 0.5, %v1977_v29 }
 0x222   : > { %v812_v49 = vmul.f32 0.044715, %v808_v43  ;;  %1487 = vtanh.f32 %v596_v56  ;;  %v691_v9 = vmul.f32 %v687_v11, %v2050_v58  ;;  %v606_v12 = vadd.f32 1.0, %v1486_v62 }
 0x223   : > { %v926_v50 = vmul.f32 0.044715, %v922_v46  ;;  %1489 = vtanh.f32 %v819_v41  ;;  %v841_v4 = vpack.c.bf16 %v2060_v34, %v2055_v59  ;;  %v2075_v26 = vmul.f32 %v607_v7, %v603_v10 }
 0x224   : > { %v816_v53 = vadd.f32 %v812_v49, %v2034_v20  ;;  %1491 = vtanh.f32 %v933_v45  ;;  %v695_v33 = vmul.f32 0.044715, %v691_v9  ;;  %v2081_v35 = vmul.f32 %v605_v6, %v601_v18 }
 0x225   : > { %v930_v23 = vadd.f32 %v926_v50, %v2038_v30  ;;  %v679_v61 = vpop.f32.mrf.mxu1  ;;  %1493 = vtanh.f32 %v931_v47  ;;  %v610_v41 = vmul.f32 %v606_v12, %v602_v22  ;;  %v828_v42 = vmul.f32 0.5, %v2034_v20 }
 0x226   : > { %v820_v0 = vmul.f32 0.7978846, %v816_v53  ;;  %v2063_v1 = vadd.f32 %v679_v61, %v1973_v27  ;;  %1495 = vtanh.f32 %v932_v57  ;;  %v942_v51 = vmul.f32 0.5, %v2038_v30 }
 0x227   : > { %v934_v2 = vmul.f32 0.7978846, %v930_v23  ;;  %v613_v52 = vpack.c.bf16 %v610_v41, %v2081_v35  ;;  %v939_v30 = vmul.f32 0.5, %v1988_v38 }
 0x228   : > { %1497 = vtanh.f32 %v820_v0  ;;  %v688_v5 = vmul.f32 %v2063_v1, %v2063_v1  ;;  %v1488_v8 = vpop.eup %1487  ;;  %v712_v22 = vmul.f32 0.5, %v2063_v1 }
 0x229   : > { %1499 = vtanh.f32 %v934_v2  ;;  %v1490_v14 = vpop.eup %1489  ;;  %v608_v16 = vadd.f32 1.0, %v1488_v8 }
 0x22a   : > { %v692_v27 = vmul.f32 %v688_v5, %v2063_v1  ;;  %v1492_v17 = vpop.eup %1491  ;;  %v831_v36 = vadd.f32 1.0, %v1490_v14 }
 0x22b   : > { %v1494_v24 = vpop.eup %1493  ;;  %v2077_v28 = vmul.f32 %v608_v16, %v604_v15  ;;  %v945_v13 = vadd.f32 1.0, %v1492_v17 }
 0x22c   : > { %v696_v25 = vmul.f32 0.044715, %v692_v27  ;;  %v1496_v31 = vpop.eup %1495  ;;  %v943_v48 = vadd.f32 1.0, %v1494_v24  ;;  %v2091_v49 = vmul.f32 %v831_v36, %v827_v32 }
 0x22d   : > { %v682_v63 = vpop.f32.mrf.mxu1  ;;  %v614_v39 = vpack.c.bf16 %v2077_v28, %v2075_v26  ;;  %v944_v54 = vadd.f32 1.0, %v1496_v31  ;;  %v949_v20 = vmul.f32 %v945_v13, %v941_v44 }
 0x22e   : > { %v1498_v37 = vpop.eup %1497  ;;  %v683_v29 = vadd.f32 %v682_v63, %v1959_v19  ;;  %v700_v47 = vadd.f32 %v696_v25, %v2063_v1  ;;  %v699_v19 = vadd.f32 %v695_v33, %v2050_v58  ;;  %v947_v2 = vmul.f32 %v943_v48, %v939_v30 }
 0x22f   : > { %v1500_v43 = vpop.eup %1499  ;;  %v832_v45 = vadd.f32 1.0, %v1498_v37  ;;  %1073 = vmatpush.bf16.msrb.mxu2 %v614_v39  ;;  %v948_v23 = vmul.f32 %v944_v54, %v940_v40  ;;  %v711_v25 = vmul.f32 0.5, %v2050_v58 }
 0x230   : > { %v946_v46 = vadd.f32 1.0, %v1500_v43  ;;  %v689_v56 = vmul.f32 %v683_v29, %v683_v29  ;;  %v704_v11 = vmul.f32 0.7978846, %v700_v47  ;;  %v703_v62 = vmul.f32 0.7978846, %v699_v19  ;;  %v1396_v19 = vld [vmem:[%s2230_s5] sm:$0xff] }
 0x231   : > { %v2093_v57 = vmul.f32 %v832_v45, %v828_v42  ;;  %v955_v8 = vpack.c.bf16 %v948_v23, %v947_v2  ;;  %v713_v12 = vmul.f32 0.5, %v683_v29 }
 0x232   : > { %v693_v50 = vmul.f32 %v689_v56, %v683_v29  ;;  %v950_v55 = vmul.f32 %v946_v46, %v942_v51  ;;  %1501 = vtanh.f32 %v704_v11 }
 0x233   : > { %v842_v3 = vpack.c.bf16 %v2093_v57, %v2091_v49  ;;  %1074 = vmatpush.bf16.msrb.mxu2 %v613_v52  ;;  %1503 = vtanh.f32 %v703_v62  ;;  %v2117_v52 = vld [vmem:[#allocation2] sm:$0xff] }
 0x234   : > { %v697_v53 = vmul.f32 0.044715, %v693_v50  ;;  %v956_v60 = vpack.c.bf16 %v950_v55, %v949_v20  ;;  %v1397_v50 = vld [vmem:[%s2230_s5 + $0x8] sm:$0xff] }
 0x235   : > { %v684_v61 = vpop.f32.mrf.mxu1 }
 0x236   : > { %v685_v0 = vadd.f32 %v684_v61, %v1961_v21  ;;  %v701_v5 = vadd.f32 %v697_v53, %v683_v29  ;;  %1372 = vmatmul.msk.bf16.vlgmr.msrb.gmra.mxu2 %vm973_vm13, %v2117_v52 }
 0x237   : > { %1189 = vmatpush.bf16.msra.mxu2 %v956_v60  ;;  %v440_v60 = vpop.permute.xlu2 %439 }
 0x238   : > { %v690_v7 = vmul.f32 %v685_v0, %v685_v0  ;;  %v705_v9 = vmul.f32 0.7978846, %v701_v5  ;;  %v1502_v6 = vpop.eup %1501  ;;  %v714_v63 = vmul.f32 0.5, %v685_v0 }
 0x239   : > { %v1504_v27 = vpop.eup %1503  ;;  %v716_v21 = vadd.f32 1.0, %v1502_v6  ;;  %v455_v6 = vpop.permute.xlu0 %454 }
 0x23a   : > { %v694_v38 = vmul.f32 %v690_v7, %v685_v0  ;;  %1505 = vtanh.f32 %v705_v9  ;;  %v715_v24 = vadd.f32 1.0, %v1504_v27 }
 0x23b   : > { %1190 = vmatpush.bf16.msra.mxu2 %v955_v8  ;;  %v720_v40 = vmul.f32 %v716_v21, %v712_v22 }
 0x23c   : > { %v698_v10 = vmul.f32 0.044715, %v694_v38  ;;  %v719_v32 = vmul.f32 %v715_v24, %v711_v25 }
 0x23d   : > { %v724_v37 = vadd.f32 %v720_v40, %v610_v41 }
 0x23e   : > { %v702_v14 = vadd.f32 %v698_v10, %v685_v0  ;;  %v723_v29 = vadd.f32 %v719_v32, %v2081_v35  ;;  %v727_v51 = vpack.c.bf16 %v720_v40, %v719_v32 }
 0x23f   : > { %v838_v1 = vadd.f32 %v2060_v34, %v724_v37 }
 0x240   : > { %v1506_v15 = vpop.eup %1505  ;;  %v706_v16 = vmul.f32 0.7978846, %v702_v14 }
 0x241   : > { %v717_v17 = vadd.f32 1.0, %v1506_v15  ;;  %v952_v46 = vadd.f32 %v948_v23, %v838_v1 }
 0x242   : > { %1507 = vtanh.f32 %v706_v16 }
 0x243   : > { %v721_v18 = vmul.f32 %v717_v17, %v713_v12  ;;  %v958_v47 = vmul.f32 0.25, %v952_v46 }
 0x245   : > { %v725_v31 = vadd.f32 %v721_v18, %v2075_v26  ;;  %v837_v26 = vadd.f32 %v2055_v59, %v723_v29 }
 0x246   : > { %1385 = vmatmul.msk.bf16.vlgmr.msra.gmra.mxu2 %vm973_vm13, %v2117_v52 }
 0x247   : > { %v839_v39 = vadd.f32 %v2091_v49, %v725_v31  ;;  %v951_v35 = vadd.f32 %v947_v2, %v837_v26 }
 0x248   : > { %v1508_v33 = vpop.eup %1507 }
 0x249   : > { %v718_v36 = vadd.f32 1.0, %v1508_v33  ;;  %v953_v42 = vadd.f32 %v949_v20, %v839_v39  ;;  %v450_v20 = vpop.permute.xlu1 %449 }
 0x24b   : > { %v722_v13 = vmul.f32 %v718_v36, %v714_v63  ;;  %v959_v41 = vmul.f32 0.25, %v953_v42 }
 0x24d   : > { %v726_v43 = vadd.f32 %v722_v13, %v2077_v28  ;;  %v728_v44 = vpack.c.bf16 %v722_v13, %v721_v18  ;;  %v957_v28 = vmul.f32 0.25, %v951_v35  ;;  %v1399_v35 = vld [vmem:[#allocation5] sm:$0xff] }
 0x24f   : > { %1111 = vmatpush.bf16.msrb.mxu3 %v728_v44  ;;  %v840_v58 = vadd.f32 %v2093_v57, %v726_v43  ;;  %v961_v48 = vpack.c.bf16 %v958_v47, %v957_v28 }
 0x251   : > { %v954_v45 = vadd.f32 %v950_v55, %v840_v58  ;;  %v445_v53 = vpop.permute.xlu1 %444 }
 0x253   : > { %1112 = vmatpush.bf16.msrb.mxu3 %v727_v51  ;;  %v960_v56 = vmul.f32 0.25, %v954_v45 }
 0x255   : > { %v962_v54 = vpack.c.bf16 %v960_v56, %v959_v41 }
 0x256   : > { %1375 = vmatmul.msk.bf16.vlgmr.msrb.gmra.mxu3 %vm973_vm13, %v2117_v52 }
 0x257   : > { %986 = vmatpush.bf16.msrb.mxu0 %v962_v54 }
 0x25b   : > { %987 = vmatpush.bf16.msrb.mxu0 %v961_v48 }
 0x25e   : > { %1361 = vmatmul.msk.bf16.vlgmr.msrb.gmra.mxu0 %vm973_vm13, %v1396_v19  ;;  %v462_v19 = vpop.permute.xlu0 %461 }
 0x26e   : > { %1362 = vmatmul.msk.bf16.gmra.mxu0 %vm973_vm13, %v1397_v50 }
 0x2b9   : > { %v1076_v54 = vpop.f32.mrf.mxu2 }
 0x2c1   : > { %v1078_v47 = vpop.f32.mrf.mxu2 }
 0x2c9   : > { %v1192_v48 = vpop.f32.mrf.mxu2 }
 0x2d9   : > { %v1114_v28 = vpop.f32.mrf.mxu3 }
 0x2db   : > { %v989_v55 = vpop.f32.mrf.mxu0 }
 0x2dc   : > { %v990_v11 = vadd.f32 %v989_v55, %v440_v60  ;;  %v467_v60 = vpop.permute.xlu2 %466 }
 0x2de   : > { %v999_v62 = vmul.f32 %v990_v11, %v990_v11  ;;  %v1023_v45 = vmul.f32 0.5, %v990_v11 }
 0x2e0   : > { %v1003_v8 = vmul.f32 %v999_v62, %v990_v11 }
 0x2e2   : > { %v1007_v14 = vmul.f32 0.044715, %v1003_v8 }
 0x2e3   : > { %v991_v30 = vpop.f32.mrf.mxu0 }
 0x2e4   : > { %v992_v23 = vadd.f32 %v991_v30, %v445_v53  ;;  %v1011_v21 = vadd.f32 %v1007_v14, %v990_v11  ;;  %v1116_v11 = vpop.f32.mrf.mxu3 }
 0x2e6   : > { %v1000_v61 = vmul.f32 %v992_v23, %v992_v23  ;;  %v1015_v40 = vmul.f32 0.7978846, %v1011_v21  ;;  %v1024_v42 = vmul.f32 0.5, %v992_v23 }
 0x2e8   : > { %v1004_v5 = vmul.f32 %v1000_v61, %v992_v23 }
 0x2ea   : > { %v1008_v38 = vmul.f32 0.044715, %v1004_v5 }
 0x2eb   : > { %v994_v0 = vpop.f32.mrf.mxu0 }
 0x2ec   : > { %v995_v2 = vadd.f32 %v994_v0, %v450_v20  ;;  %v1012_v17 = vadd.f32 %v1008_v38, %v992_v23  ;;  %v1194_v0 = vpop.f32.mrf.mxu2 }
 0x2ee   : > { %v1001_v7 = vmul.f32 %v995_v2, %v995_v2  ;;  %v1016_v25 = vmul.f32 0.7978846, %v1012_v17  ;;  %v1025_v29 = vmul.f32 0.5, %v995_v2 }
 0x2f0   : > { %v1005_v9 = vmul.f32 %v1001_v7, %v995_v2 }
 0x2f2   : > { %v1009_v10 = vmul.f32 0.044715, %v1005_v9 }
 0x2f3   : > { %v996_v27 = vpop.f32.mrf.mxu0 }
 0x2f4   : > { %v997_v15 = vadd.f32 %v996_v27, %v455_v6  ;;  %v1013_v16 = vadd.f32 %v1009_v10, %v995_v2 }
 0x2f6   : > { %v1002_v12 = vmul.f32 %v997_v15, %v997_v15  ;;  %v1017_v22 = vmul.f32 0.7978846, %v1013_v16  ;;  %v1026_v39 = vmul.f32 0.5, %v997_v15 }
 0x2f8   : > { %v1006_v18 = vmul.f32 %v1002_v12, %v997_v15  ;;  %1509 = vtanh.f32 %v1017_v22 }
 0x2f9   : > { %1511 = vtanh.f32 %v1016_v25 }
 0x2fa   : > { %v1010_v24 = vmul.f32 0.044715, %v1006_v18  ;;  %1513 = vtanh.f32 %v1015_v40 }
 0x2fc   : > { %v1014_v31 = vadd.f32 %v1010_v24, %v997_v15 }
 0x2fe   : > { %v1018_v32 = vmul.f32 0.7978846, %v1014_v31  ;;  %v1510_v33 = vpop.eup %1509 }
 0x2ff   : > { %v1512_v63 = vpop.eup %1511  ;;  %v1029_v37 = vadd.f32 1.0, %v1510_v33 }
 0x300   : > { %1515 = vtanh.f32 %v1018_v32  ;;  %v1514_v36 = vpop.eup %1513  ;;  %v1028_v44 = vadd.f32 1.0, %v1512_v63 }
 0x301   : > { %v1033_v1 = vmul.f32 %v1029_v37, %v1025_v29  ;;  %v1027_v26 = vadd.f32 1.0, %v1514_v36 }
 0x302   : > { %v1032_v46 = vmul.f32 %v1028_v44, %v1024_v42 }
 0x303   : > { %v1031_v41 = vmul.f32 %v1027_v26, %v1023_v45 }
 0x305   : > { %v1035_v56 = vpack.c.bf16 %v1032_v46, %v1031_v41  ;;  %v1373_v41 = vld [vmem:[%s1807_s29 + $0x10] sm:$0xff] }
 0x306   : > { %v1516_v13 = vpop.eup %1515 }
 0x307   : > { %v1030_v43 = vadd.f32 1.0, %v1516_v13 }
 0x309   : > { %v1034_v58 = vmul.f32 %v1030_v43, %v1026_v39 }
 0x30b   : > { %v1036_v51 = vpack.c.bf16 %v1034_v58, %v1033_v1 }
 0x30d   : > { %1051 = vmatpush.bf16.msrb.mxu1 %v1036_v51 }
 0x311   : > { %1052 = vmatpush.bf16.msrb.mxu1 %v1035_v56 }
 0x314   : > { %1367 = vmatmul.msk.bf16.vlgmr.msrb.gmra.mxu1 %vm973_vm13, %v1399_v35 }
 0x315   : > { %1150 = vmatpush.bf16.msra.mxu1 %v842_v3 }
 0x319   : > { %1151 = vmatpush.bf16.msra.mxu1 %v841_v4 }
 0x324   : > { %1380 = vmatmul.msk.bf16.vlgmr.msra.gmra.mxu1 %vm973_vm13, %v2117_v52 }
 0x391   : > { %v1054_v50 = vpop.f32.mrf.mxu1 }
 0x392   : > { %v1055_v20 = vadd.f32 %v1054_v50, %v462_v19  ;;  %v1533_v50 = vld [vmem:[%s1807_s29] sm:$0xff] }
 0x394   : > { %v1077_v55 = vadd.f32 %v1076_v54, %v1055_v20  ;;  %v1115_v30 = vadd.f32 %v1114_v28, %v1055_v20  ;;  %v1193_v49 = vadd.f32 %v1192_v48, %v1055_v20  ;;  %v1383_v28 = vld [vmem:[%s1807_s29 + $0x30] sm:$0xff] }
 0x396   : > { %v1081_v57 = vmul.f32 %v1077_v55, %v1077_v55  ;;  %v1119_v3 = vmul.f32 %v1115_v30, %v1115_v30  ;;  %v1197_v53 = vmul.f32 %v1193_v49, %v1193_v49  ;;  %v1093_v43 = vmul.f32 0.5, %v1077_v55 }
 0x397   : > { %v1131_v26 = vmul.f32 0.5, %v1115_v30  ;;  %v1209_v56 = vmul.f32 0.5, %v1193_v49 }
 0x398   : > { %v1083_v23 = vmul.f32 %v1081_v57, %v1077_v55  ;;  %v1121_v59 = vmul.f32 %v1119_v3, %v1115_v30  ;;  %v1199_v34 = vmul.f32 %v1197_v53, %v1193_v49 }
 0x399   : > { %v1056_v4 = vpop.f32.mrf.mxu1 }
 0x39a   : > { %v1085_v52 = vmul.f32 0.044715, %v1083_v23  ;;  %v1123_v61 = vmul.f32 0.044715, %v1121_v59  ;;  %v1057_v62 = vadd.f32 %v1056_v4, %v467_v60  ;;  %v1201_v2 = vmul.f32 0.044715, %v1199_v34 }
 0x39c   : > { %v1087_v5 = vadd.f32 %v1085_v52, %v1077_v55  ;;  %v1125_v7 = vadd.f32 %v1123_v61, %v1115_v30  ;;  %v2134_v8 = vadd.f32 %v1078_v47, %v1057_v62  ;;  %v2136_v9 = vadd.f32 %v1116_v11, %v1057_v62 }
 0x39d   : > { %v1203_v38 = vadd.f32 %v1201_v2, %v1193_v49  ;;  %v2138_v10 = vadd.f32 %v1194_v0, %v1057_v62  ;;  %v1374_v0 = vld [vmem:[%s1807_s29 + $0x18] sm:$0xff] }
 0x39e   : > { %v1089_v6 = vmul.f32 0.7978846, %v1087_v5  ;;  %v1127_v14 = vmul.f32 0.7978846, %v1125_v7  ;;  %v1082_v27 = vmul.f32 %v2134_v8, %v2134_v8  ;;  %v1120_v16 = vmul.f32 %v2136_v9, %v2136_v9 }
 0x39f   : > { %v1205_v15 = vmul.f32 0.7978846, %v1203_v38  ;;  %v1198_v12 = vmul.f32 %v2138_v10, %v2138_v10  ;;  %v1094_v59 = vmul.f32 0.5, %v2134_v8  ;;  %v1132_v11 = vmul.f32 0.5, %v2136_v9  ;;  %v1384_v38 = vld [vmem:[%s1807_s29 + $0x38] sm:$0xff] }
 0x3a0   : > { %1517 = vtanh.f32 %v1089_v6  ;;  %v1084_v17 = vmul.f32 %v1082_v27, %v2134_v8  ;;  %v1122_v21 = vmul.f32 %v1120_v16, %v2136_v9  ;;  %v1210_v2 = vmul.f32 0.5, %v2138_v10 }
 0x3a1   : > { %1519 = vtanh.f32 %v1127_v14  ;;  %v1200_v18 = vmul.f32 %v1198_v12, %v2138_v10  ;;  %v1153_v22 = vpop.f32.mrf.mxu1 }
 0x3a2   : > { %1521 = vtanh.f32 %v1205_v15  ;;  %v1086_v24 = vmul.f32 0.044715, %v1084_v17  ;;  %v2149_v25 = vadd.f32 %v1153_v22, %v1055_v20  ;;  %v1124_v40 = vmul.f32 0.044715, %v1122_v21  ;;  %v1378_v21 = vld [vmem:[%s1807_s29 + $0x20] sm:$0xff] }
 0x3a3   : > { %v1202_v31 = vmul.f32 0.044715, %v1200_v18 }
 0x3a4   : > { %v1088_v32 = vadd.f32 %v1086_v24, %v2134_v8  ;;  %v1158_v33 = vmul.f32 %v2149_v25, %v2149_v25  ;;  %v1126_v63 = vadd.f32 %v1124_v40, %v2136_v9  ;;  %v1534_v8 = vld [vmem:[%s1807_s29 + $0x8] sm:$0xff] }
 0x3a5   : > { %v1204_v36 = vadd.f32 %v1202_v31, %v2138_v10  ;;  %v1170_v10 = vmul.f32 0.5, %v2149_v25  ;;  %v1379_v31 = vld [vmem:[%s1807_s29 + $0x28] sm:$0xff] }
 0x3a6   : > { %v1518_v37 = vpop.eup %1517  ;;  %v1090_v13 = vmul.f32 0.7978846, %v1088_v32  ;;  %v1160_v29 = vmul.f32 %v1158_v33, %v2149_v25  ;;  %v1128_v1 = vmul.f32 0.7978846, %v1126_v63 }
 0x3a7   : > { %v1520_v39 = vpop.eup %1519  ;;  %v1095_v44 = vadd.f32 1.0, %v1518_v37  ;;  %v1206_v58 = vmul.f32 0.7978846, %v1204_v36 }
 0x3a8   : > { %v1522_v42 = vpop.eup %1521  ;;  %v1133_v51 = vadd.f32 1.0, %v1520_v39  ;;  %1523 = vtanh.f32 %v1090_v13  ;;  %v1162_v45 = vmul.f32 0.044715, %v1160_v29 }
 0x3a9   : > { %v1097_v46 = vmul.f32 %v1095_v44, %v1093_v43  ;;  %v1211_v35 = vadd.f32 1.0, %v1522_v42  ;;  %1525 = vtanh.f32 %v1128_v1  ;;  %v1155_v54 = vpop.f32.mrf.mxu1 }
 0x3aa   : > { %v1135_v47 = vmul.f32 %v1133_v51, %v1131_v26  ;;  %1527 = vtanh.f32 %v1206_v58  ;;  %v1164_v48 = vadd.f32 %v1162_v45, %v2149_v25  ;;  %v1156_v19 = vadd.f32 %v1155_v54, %v1057_v62 }
 0x3ab   : > { %v1099_v20 = vadd.f32 %v1533_v50, %v1097_v46  ;;  %v1213_v55 = vmul.f32 %v1211_v35, %v1209_v56 }
 0x3ac   : > { %v1137_v57 = vadd.f32 %v1373_v41, %v1135_v47  ;;  %v1166_v30 = vmul.f32 0.7978846, %v1164_v48  ;;  %v1159_v3 = vmul.f32 %v1156_v19, %v1156_v19  ;;  %v1171_v25 = vmul.f32 0.5, %v1156_v19 }
 0x3ad   : > { %1101 = vst.msk [vmem:[%s2164_s21] sm:$0xff] %vm471_vm0, %v1099_v20  ;;  %v1215_v49 = vadd.f32 %v1383_v28, %v1213_v55 }
 0x3ae   : > { %v1524_v53 = vpop.eup %1523  ;;  %1376 = vst.msk [vmem:[%s2164_s21 + $0x10] sm:$0xff] %vm471_vm0, %v1137_v57  ;;  %1529 = vtanh.f32 %v1166_v30  ;;  %v1161_v60 = vmul.f32 %v1159_v3, %v1156_v19 }
 0x3af   : > { %v1526_v23 = vpop.eup %1525  ;;  %1386 = vst.msk [vmem:[%s2164_s21 + $0x30] sm:$0xff] %vm471_vm0, %v1215_v49  ;;  %v1096_v34 = vadd.f32 1.0, %v1524_v53 }
 0x3b0   : > { %v1528_v4 = vpop.eup %1527  ;;  %v1134_v52 = vadd.f32 1.0, %v1526_v23  ;;  %v1163_v61 = vmul.f32 0.044715, %v1161_v60 }
 0x3b1   : > { %v1098_v62 = vmul.f32 %v1096_v34, %v1094_v59  ;;  %v1212_v5 = vadd.f32 1.0, %v1528_v4 }
 0x3b2   : > { %v1136_v7 = vmul.f32 %v1134_v52, %v1132_v11  ;;  %v1165_v6 = vadd.f32 %v1163_v61, %v1156_v19 }
 0x3b3   : > { %v1100_v14 = vadd.f32 %v1534_v8, %v1098_v62  ;;  %v1214_v27 = vmul.f32 %v1212_v5, %v1210_v2 }
 0x3b4   : > { %v1530_v9 = vpop.eup %1529  ;;  %v1138_v15 = vadd.f32 %v1374_v0, %v1136_v7  ;;  %v1167_v16 = vmul.f32 0.7978846, %v1165_v6 }
 0x3b5   : > { %1102 = vst.msk [vmem:[%s2164_s21 + $0x8] sm:$0xff] %vm471_vm0, %v1100_v14  ;;  %v1216_v12 = vadd.f32 %v1384_v38, %v1214_v27  ;;  %v1172_v17 = vadd.f32 1.0, %v1530_v9 }
 0x3b6   : > { %1377 = vst.msk [vmem:[%s2164_s21 + $0x18] sm:$0xff] %vm471_vm0, %v1138_v15  ;;  %1531 = vtanh.f32 %v1167_v16 }
 0x3b7   : > { %1387 = vst.msk [vmem:[%s2164_s21 + $0x38] sm:$0xff] %vm471_vm0, %v1216_v12  ;;  %v1174_v18 = vmul.f32 %v1172_v17, %v1170_v10 }
 0x3b9   : > { %v1176_v22 = vadd.f32 %v1378_v21, %v1174_v18 }
 0x3bb   : > { %1381 = vst.msk [vmem:[%s2164_s21 + $0x20] sm:$0xff] %vm471_vm0, %v1176_v22 }
 0x3bc   : > { %v1532_v24 = vpop.eup %1531 }
 0x3bd   : > { %v1173_v40 = vadd.f32 1.0, %v1532_v24 }
 0x3bf   : > { %v1175_v32 = vmul.f32 %v1173_v40, %v1171_v25 }
 0x3c1   : > { %v1177_v33 = vadd.f32 %v1379_v31, %v1175_v32 }
 0x3c3   : > { %1382 = vst.msk [vmem:[%s2164_s21 + $0x28] sm:$0xff] %vm471_vm0, %v1177_v33 }
 0x3c4   : > { %1622 = shalt.err (!%p1619_p8)
}
 0x3c5   : > { %s1672_s18 = smov 128   ;;  %s1673_s21 = smov 8  }
 0x3c6   : > { %1409 = dma.vmem_to_hbm [thread:$0]  (%p1767_p5), %s1234_s25, 1024, %s1236_s30, %s1221_s17, %s1672_s18, %s1672_s18, %s1673_s21  }
 0x3c7 PF: > { %p1426_p9 = scmp.ge.s32.totalorder %s1665_s16, 2  ;;  %s1250_s28 = sand.u32 1, %s1653_s13  }
 0x3c8   : > { %s1251_s20 = scalar_lea.sflag [#allocation4], %s1250_s28 }
 0x3c9   : > { %p1419_p10 = pnand %p1426_p9, %p1771_p6 }
 0x3cb   : > { %p1420_p11 = pneg %p1419_p10 }
 0x3cd   : > { %1648 = dma.done.wait (%p1420_p11), %s1251_s20, 1024  }
 0x3ce   : > { %1650 = vsyncadd (%p1420_p11), %s1251_s20, 4294966272  ;;  %s2240_s11 = sld [smem:[#allocation11_spill]]  ;;  %p22_p12 = scmp.ge.s32.totalorder %s1754_s19, 4  }
 0x3cf   : > { %s2241_s13 = smov %s1657_s14  ;;  %s2242_s14 = smov %s1661_s15 }
 0x3d0   : > { %s2244_s16 = smov %s1754_s19  ;;  %24 = sbr.rel (!%p22_p12) target bundleno = 5 (0x5), region = 110 }
 0x3d4   : > { %s2243_s15 = smov %s2240_s11 }
 0x3d5   :  { %1257 = vsyncpa [#allocation3], 1 }
 0x3d6   :  { %1259 = vsyncpa [#allocation3 + $0x1], 1 }
 0x3d7   :  { %1260 = vsyncpa [#allocation6], 1 }
 0x3d8   :  { %1261 = vsyncpa [#allocation4], 1 }
 0x3d9   :  { %1263 = vsyncpa [#allocation4 + $0x1], 1 }

</bundles_post_ra>
